<compile_context>
chip_gen: v6e
topology: v6e:2x2x1
jax: 0.10.0
libtpu: 0.0.40
codegen_flags: <defaults>
</compile_context>

<pallas_src>
import math

import jax
import jax.numpy as jnp
from jax.experimental import pallas as pl
from jax.experimental.pallas import tpu as pltpu

LEAK = 0.01                      # LeakyReLU negative slope (torch default here)
_IN_DIMS = (16, 32, 64, 128, 256, 512)


def _round_up(x, m):
    return ((x + m - 1) // m) * m


def _make_decoder_kernel(out_dims, bias_offsets):
    """Build the fused 6-layer MLP kernel.

    out_dims / bias_offsets are static, kernel-view per-layer sizes (the last
    layer's width is already padded to a multiple of 128).
    """

    def kernel(x_ref, w1, w2, w3, w4, w5, w6, b_ref, out_ref):
        w_refs = (w1, w2, w3, w4, w5, w6)
        h = x_ref[...]                                     # (TB, 16) bf16
        y = None
        for li, w_ref in enumerate(w_refs):
            off, n = bias_offsets[li], out_dims[li]
            # MXU matmul: bf16 x bf16 -> f32 accumulate.
            y = jnp.dot(h, w_ref[...], preferred_element_type=jnp.float32)
            y = y + b_ref[:, off:off + n]                  # f32 bias add
            if li < 5:                                     # LeakyReLU fc1..fc5
                y = jnp.where(y > 0, y, LEAK * y)
                h = y.astype(jnp.bfloat16)                 # bf16 back into MXU
        out_ref[...] = y                                   # (TB, out_dim_p) f32

    return kernel


def init_params(key, size):
    """nn.Linear-style init: U(-1/sqrt(fan_in), 1/sqrt(fan_in)) for W and b."""
    dims = list(_IN_DIMS) + [size[0] * size[1]]
    params = []
    for i in range(6):
        fan_in, fan_out = dims[i], dims[i + 1]
        key, kw, kb = jax.random.split(key, 3)
        bound = 1.0 / math.sqrt(fan_in)
        w = jax.random.uniform(kw, (fan_in, fan_out), jnp.float32, -bound, bound)
        b = jax.random.uniform(kb, (1, fan_out), jnp.float32, -bound, bound)
        params.append((w, b))
    return params


def neuralnet_decoder(x, params, size):
    """Pallas-backed forward pass; each row of flatten(x).reshape(-1,16) is a sample."""
    out_dim = size[0] * size[1]
    out_dim_p = _round_up(out_dim, 128)                    # lane-dense output

    assert x.size % 16 == 0, "flattened input must be a multiple of 16 features"
    xf = jnp.reshape(x, (-1, 16)).astype(jnp.bfloat16)
    B = xf.shape[0]

    # Batch tile: 128 rows (raise to 256 on v6e/v7x if desired); small batches
    # use one full-extent tile rounded to the sublane granule.
    if B >= 128:
        TB = 128
    else:
        TB = max(8, _round_up(B, 8))
    Bp = _round_up(B, TB)
    if Bp != B:
        xf = jnp.pad(xf, ((0, Bp - B), (0, 0)))
    grid = (Bp // TB,)

    # Kernel-view layer output widths (last layer padded to out_dim_p).
    out_dims = (32, 64, 128, 256, 512, out_dim_p)

    # bf16 weights; pad fc6 columns up to out_dim_p.
    ws = []
    for i, (w, b) in enumerate(params):
        w = w.astype(jnp.bfloat16)
        if i == 5 and out_dim_p != out_dim:
            w = jnp.pad(w, ((0, 0), (0, out_dim_p - out_dim)))
        ws.append(w)

    # One concatenated, 128-lane-aligned f32 bias buffer (fewer DMA operands).
    seg_sizes = [_round_up(d, 128) for d in out_dims]
    bias_offsets = [0]
    for s in seg_sizes[:-1]:
        bias_offsets.append(bias_offsets[-1] + s)
    segs = []
    for i, (w, b) in enumerate(params):
        b = jnp.reshape(b, (1, -1)).astype(jnp.float32)
        segs.append(jnp.pad(b, ((0, 0), (0, seg_sizes[i] - b.shape[1]))))
    bias_buf = jnp.concatenate(segs, axis=1)               # (1, 1408) for 16x16

    kernel = _make_decoder_kernel(out_dims, tuple(bias_offsets))

    # Specs: x/out tiled over batch; weights + bias constant -> VMEM-resident.
    in_specs = [pl.BlockSpec((TB, 16), lambda i: (i, 0))]
    for w in ws:
        in_specs.append(pl.BlockSpec(w.shape, lambda i: (0, 0)))
    in_specs.append(pl.BlockSpec(bias_buf.shape, lambda i: (0, 0)))
    out_specs = pl.BlockSpec((TB, out_dim_p), lambda i: (i, 0))

    flops = 2 * Bp * sum(k * n for k, n in zip(_IN_DIMS, out_dims))
    bytes_accessed = (sum(int(w.size) * 2 for w in ws)
                      + int(bias_buf.size) * 4
                      + Bp * 16 * 2
                      + Bp * out_dim_p * 4)
    cost = pl.CostEstimate(flops=flops, transcendentals=0,
                           bytes_accessed=bytes_accessed)

    out = pl.pallas_call(
        kernel,
        out_shape=jax.ShapeDtypeStruct((Bp, out_dim_p), jnp.float32),
        grid=grid,
        in_specs=in_specs,
        out_specs=out_specs,
        compiler_params=pltpu.CompilerParams(
            dimension_semantics=("parallel",)),
        cost_estimate=cost,
    )(xf, *ws, bias_buf)

    out = out[:B, :out_dim]
    return out.reshape(-1, size[0], size[1])               # x.view(-1, s0, s1)


def _reference(x, params, size):
    """Pure-JAX reference mirroring the kernel's bf16-weight / f32-acc math."""
    h = jnp.reshape(x, (-1, 16)).astype(jnp.float32)
    for i, (w, b) in enumerate(params):
        h = jnp.dot(h.astype(jnp.bfloat16), w.astype(jnp.bfloat16),
                    preferred_element_type=jnp.float32) + b
        if i < 5:
            h = jnp.where(h > 0, h, LEAK * h)
    return h.reshape(-1, size[0], size[1])


if __name__ == "__main__":
    size = (16, 16)                       # fc6: 512 -> 256

    key = jax.random.PRNGKey(0)
    key_xb, key_x1, key_p = jax.random.split(key, 3)
    params = init_params(key_p, size)

    # Batched run: 256 independent 16-feature samples (grid of 2 batch tiles).
    x_batch = jax.random.normal(key_xb, (256, 16), dtype=jnp.float32)
    out_b = jax.block_until_ready(neuralnet_decoder(x_batch, params, size))
    ref_b = _reference(x_batch, params, size)
    assert out_b.shape == (256, size[0], size[1]), out_b.shape
    assert jnp.allclose(out_b, ref_b, atol=1e-2, rtol=1e-2), "batched mismatch"

    # Single-sample run: exact torch semantics (flatten((4,4)) -> 16 features).
    x_single = jax.random.normal(key_x1, (4, 4), dtype=jnp.float32)
    out_s = jax.block_until_ready(neuralnet_decoder(x_single, params, size))
    ref_s = _reference(x_single, params, size)
    assert out_s.shape == (1, size[0], size[1]), out_s.shape
    assert jnp.allclose(out_s, ref_s, atol=1e-2, rtol=1e-2), "single mismatch"

    print("KERNEL_OK")
</pallas_src>

<mosaic_0001>
module attributes {stable_mosaic.version = 11 : i64} {
  func.func @kernel(%arg0: i32, %arg1: memref<128x16xbf16, #tpu.memory_space<vmem>>, %arg2: memref<16x32xbf16, #tpu.memory_space<vmem>>, %arg3: memref<32x64xbf16, #tpu.memory_space<vmem>>, %arg4: memref<64x128xbf16, #tpu.memory_space<vmem>>, %arg5: memref<128x256xbf16, #tpu.memory_space<vmem>>, %arg6: memref<256x512xbf16, #tpu.memory_space<vmem>>, %arg7: memref<512x256xbf16, #tpu.memory_space<vmem>>, %arg8: memref<1x1408xf32, #tpu.memory_space<vmem>>, %arg9: memref<128x256xf32, #tpu.memory_space<vmem>>) attributes {dimension_semantics = [#tpu.dimension_semantics<parallel>], iteration_bounds = array<i64: 2>, scalar_prefetch = 0 : i64, scratch_operands = 0 : i64, tpu.core_type = #tpu.core_type<tc>, window_params = [{transform_indices = @transform_0, window_bounds = array<i64: 128, 16>}, {pipeline_mode = #tpu.pipeline_mode<synchronous>, transform_indices = @transform_1, window_bounds = array<i64: 16, 32>}, {pipeline_mode = #tpu.pipeline_mode<synchronous>, transform_indices = @transform_2, window_bounds = array<i64: 32, 64>}, {pipeline_mode = #tpu.pipeline_mode<synchronous>, transform_indices = @transform_3, window_bounds = array<i64: 64, 128>}, {pipeline_mode = #tpu.pipeline_mode<synchronous>, transform_indices = @transform_4, window_bounds = array<i64: 128, 256>}, {pipeline_mode = #tpu.pipeline_mode<synchronous>, transform_indices = @transform_5, window_bounds = array<i64: 256, 512>}, {pipeline_mode = #tpu.pipeline_mode<synchronous>, transform_indices = @transform_6, window_bounds = array<i64: 512, 256>}, {pipeline_mode = #tpu.pipeline_mode<synchronous>, transform_indices = @transform_7, window_bounds = array<i64: 1, 1408>}, {transform_indices = @transform_8, window_bounds = array<i64: 128, 256>}]} {
    %c0 = arith.constant 0 : index
    %c0_0 = arith.constant 0 : index
    %0 = vector.load %arg1[%c0, %c0_0] : memref<128x16xbf16, #tpu.memory_space<vmem>>, vector<128x16xbf16>
    %c0_1 = arith.constant 0 : index
    %c0_2 = arith.constant 0 : index
    %1 = vector.load %arg2[%c0_1, %c0_2] : memref<16x32xbf16, #tpu.memory_space<vmem>>, vector<16x32xbf16>
    %cst = arith.constant dense<0.000000e+00> : vector<128x32xf32>
    %2 = tpu.matmul %0, %1, %cst {dimension_numbers = #tpu.dot_dimension_numbers<[1], [0], [0], [1], [0, 0, 1, 1], [], []>} : vector<128x16xbf16>, vector<16x32xbf16>, vector<128x32xf32> -> vector<128x32xf32>
    %c0_3 = arith.constant 0 : index
    %c0_4 = arith.constant 0 : index
    %3 = vector.load %arg8[%c0_3, %c0_4] : memref<1x1408xf32, #tpu.memory_space<vmem>>, vector<1x32xf32>
    %4 = vector.broadcast %3 : vector<1x32xf32> to vector<128x32xf32>
    %5 = arith.addf %2, %4 : vector<128x32xf32>
    %cst_5 = arith.constant 0.000000e+00 : f32
    %6 = vector.broadcast %cst_5 : f32 to vector<128x32xf32>
    %7 = arith.cmpf ogt, %5, %6 : vector<128x32xf32>
    %cst_6 = arith.constant 0.00999999977 : f32
    %8 = vector.broadcast %cst_6 : f32 to vector<128x32xf32>
    %9 = arith.mulf %8, %5 : vector<128x32xf32>
    %10 = arith.select %7, %5, %9 : vector<128x32xi1>, vector<128x32xf32>
    %11 = arith.truncf %10 : vector<128x32xf32> to vector<128x32xbf16>
    %c0_7 = arith.constant 0 : index
    %c0_8 = arith.constant 0 : index
    %12 = vector.load %arg3[%c0_7, %c0_8] : memref<32x64xbf16, #tpu.memory_space<vmem>>, vector<32x64xbf16>
    %cst_9 = arith.constant dense<0.000000e+00> : vector<128x64xf32>
    %13 = tpu.matmul %11, %12, %cst_9 {dimension_numbers = #tpu.dot_dimension_numbers<[1], [0], [0], [1], [0, 0, 1, 1], [], []>} : vector<128x32xbf16>, vector<32x64xbf16>, vector<128x64xf32> -> vector<128x64xf32>
    %c0_10 = arith.constant 0 : index
    %c128 = arith.constant 128 : index
    %14 = vector.load %arg8[%c0_10, %c128] : memref<1x1408xf32, #tpu.memory_space<vmem>>, vector<1x64xf32>
    %15 = vector.broadcast %14 : vector<1x64xf32> to vector<128x64xf32>
    %16 = arith.addf %13, %15 : vector<128x64xf32>
    %cst_11 = arith.constant 0.000000e+00 : f32
    %17 = vector.broadcast %cst_11 : f32 to vector<128x64xf32>
    %18 = arith.cmpf ogt, %16, %17 : vector<128x64xf32>
    %cst_12 = arith.constant 0.00999999977 : f32
    %19 = vector.broadcast %cst_12 : f32 to vector<128x64xf32>
    %20 = arith.mulf %19, %16 : vector<128x64xf32>
    %21 = arith.select %18, %16, %20 : vector<128x64xi1>, vector<128x64xf32>
    %22 = arith.truncf %21 : vector<128x64xf32> to vector<128x64xbf16>
    %c0_13 = arith.constant 0 : index
    %c0_14 = arith.constant 0 : index
    %23 = vector.load %arg4[%c0_13, %c0_14] : memref<64x128xbf16, #tpu.memory_space<vmem>>, vector<64x128xbf16>
    %cst_15 = arith.constant dense<0.000000e+00> : vector<128x128xf32>
    %24 = tpu.matmul %22, %23, %cst_15 {dimension_numbers = #tpu.dot_dimension_numbers<[1], [0], [0], [1], [0, 0, 1, 1], [], []>} : vector<128x64xbf16>, vector<64x128xbf16>, vector<128x128xf32> -> vector<128x128xf32>
    %c0_16 = arith.constant 0 : index
    %c256 = arith.constant 256 : index
    %25 = vector.load %arg8[%c0_16, %c256] : memref<1x1408xf32, #tpu.memory_space<vmem>>, vector<1x128xf32>
    %26 = vector.broadcast %25 : vector<1x128xf32> to vector<128x128xf32>
    %27 = arith.addf %24, %26 : vector<128x128xf32>
    %cst_17 = arith.constant 0.000000e+00 : f32
    %28 = vector.broadcast %cst_17 : f32 to vector<128x128xf32>
    %29 = arith.cmpf ogt, %27, %28 : vector<128x128xf32>
    %cst_18 = arith.constant 0.00999999977 : f32
    %30 = vector.broadcast %cst_18 : f32 to vector<128x128xf32>
    %31 = arith.mulf %30, %27 : vector<128x128xf32>
    %32 = arith.select %29, %27, %31 : vector<128x128xi1>, vector<128x128xf32>
    %33 = arith.truncf %32 : vector<128x128xf32> to vector<128x128xbf16>
    %c0_19 = arith.constant 0 : index
    %c0_20 = arith.constant 0 : index
    %34 = vector.load %arg5[%c0_19, %c0_20] : memref<128x256xbf16, #tpu.memory_space<vmem>>, vector<128x256xbf16>
    %cst_21 = arith.constant dense<0.000000e+00> : vector<128x256xf32>
    %35 = tpu.matmul %33, %34, %cst_21 {dimension_numbers = #tpu.dot_dimension_numbers<[1], [0], [0], [1], [0, 0, 1, 1], [], []>} : vector<128x128xbf16>, vector<128x256xbf16>, vector<128x256xf32> -> vector<128x256xf32>
    %c0_22 = arith.constant 0 : index
    %c384 = arith.constant 384 : index
    %36 = vector.load %arg8[%c0_22, %c384] : memref<1x1408xf32, #tpu.memory_space<vmem>>, vector<1x256xf32>
    %37 = vector.broadcast %36 : vector<1x256xf32> to vector<128x256xf32>
    %38 = arith.addf %35, %37 : vector<128x256xf32>
    %cst_23 = arith.constant 0.000000e+00 : f32
    %39 = vector.broadcast %cst_23 : f32 to vector<128x256xf32>
    %40 = arith.cmpf ogt, %38, %39 : vector<128x256xf32>
    %cst_24 = arith.constant 0.00999999977 : f32
    %41 = vector.broadcast %cst_24 : f32 to vector<128x256xf32>
    %42 = arith.mulf %41, %38 : vector<128x256xf32>
    %43 = arith.select %40, %38, %42 : vector<128x256xi1>, vector<128x256xf32>
    %44 = arith.truncf %43 : vector<128x256xf32> to vector<128x256xbf16>
    %c0_25 = arith.constant 0 : index
    %c0_26 = arith.constant 0 : index
    %45 = vector.load %arg6[%c0_25, %c0_26] : memref<256x512xbf16, #tpu.memory_space<vmem>>, vector<256x512xbf16>
    %cst_27 = arith.constant dense<0.000000e+00> : vector<128x512xf32>
    %46 = tpu.matmul %44, %45, %cst_27 {dimension_numbers = #tpu.dot_dimension_numbers<[1], [0], [0], [1], [0, 0, 1, 1], [], []>} : vector<128x256xbf16>, vector<256x512xbf16>, vector<128x512xf32> -> vector<128x512xf32>
    %c0_28 = arith.constant 0 : index
    %c640 = arith.constant 640 : index
    %47 = vector.load %arg8[%c0_28, %c640] : memref<1x1408xf32, #tpu.memory_space<vmem>>, vector<1x512xf32>
    %48 = vector.broadcast %47 : vector<1x512xf32> to vector<128x512xf32>
    %49 = arith.addf %46, %48 : vector<128x512xf32>
    %cst_29 = arith.constant 0.000000e+00 : f32
    %50 = vector.broadcast %cst_29 : f32 to vector<128x512xf32>
    %51 = arith.cmpf ogt, %49, %50 : vector<128x512xf32>
    %cst_30 = arith.constant 0.00999999977 : f32
    %52 = vector.broadcast %cst_30 : f32 to vector<128x512xf32>
    %53 = arith.mulf %52, %49 : vector<128x512xf32>
    %54 = arith.select %51, %49, %53 : vector<128x512xi1>, vector<128x512xf32>
    %55 = arith.truncf %54 : vector<128x512xf32> to vector<128x512xbf16>
    %c0_31 = arith.constant 0 : index
    %c0_32 = arith.constant 0 : index
    %56 = vector.load %arg7[%c0_31, %c0_32] : memref<512x256xbf16, #tpu.memory_space<vmem>>, vector<512x256xbf16>
    %cst_33 = arith.constant dense<0.000000e+00> : vector<128x256xf32>
    %57 = tpu.matmul %55, %56, %cst_33 {dimension_numbers = #tpu.dot_dimension_numbers<[1], [0], [0], [1], [0, 0, 1, 1], [], []>} : vector<128x512xbf16>, vector<512x256xbf16>, vector<128x256xf32> -> vector<128x256xf32>
    %c0_34 = arith.constant 0 : index
    %c1152 = arith.constant 1152 : index
    %58 = vector.load %arg8[%c0_34, %c1152] : memref<1x1408xf32, #tpu.memory_space<vmem>>, vector<1x256xf32>
    %59 = vector.broadcast %58 : vector<1x256xf32> to vector<128x256xf32>
    %60 = arith.addf %57, %59 : vector<128x256xf32>
    %c0_35 = arith.constant 0 : index
    %c0_36 = arith.constant 0 : index
    %61 = vector.load %arg9[%c0_35, %c0_36] : memref<128x256xf32, #tpu.memory_space<vmem>>, vector<128x256xf32>
    tpu.vector_store %arg9[%c0_35, %c0_36], %60 {strides = array<i32>} : memref<128x256xf32, #tpu.memory_space<vmem>>, vector<128x256xf32>,
    return
  }
  func.func @transform_0(%arg0: i32) -> (i32, i32) {
    %c0_i32 = arith.constant 0 : i32
    %c0_i32_0 = arith.constant 0 : i32
    return %arg0, %c0_i32 : i32, i32
  }
  func.func @transform_1(%arg0: i32) -> (i32, i32) {
    %c0_i32 = arith.constant 0 : i32
    %c0_i32_0 = arith.constant 0 : i32
    %c0_i32_1 = arith.constant 0 : i32
    return %c0_i32, %c0_i32_0 : i32, i32
  }
  func.func @transform_2(%arg0: i32) -> (i32, i32) {
    %c0_i32 = arith.constant 0 : i32
    %c0_i32_0 = arith.constant 0 : i32
    %c0_i32_1 = arith.constant 0 : i32
    return %c0_i32, %c0_i32_0 : i32, i32
  }
  func.func @transform_3(%arg0: i32) -> (i32, i32) {
    %c0_i32 = arith.constant 0 : i32
    %c0_i32_0 = arith.constant 0 : i32
    %c0_i32_1 = arith.constant 0 : i32
    return %c0_i32, %c0_i32_0 : i32, i32
  }
  func.func @transform_4(%arg0: i32) -> (i32, i32) {
    %c0_i32 = arith.constant 0 : i32
    %c0_i32_0 = arith.constant 0 : i32
    %c0_i32_1 = arith.constant 0 : i32
    return %c0_i32, %c0_i32_0 : i32, i32
  }
  func.func @transform_5(%arg0: i32) -> (i32, i32) {
    %c0_i32 = arith.constant 0 : i32
    %c0_i32_0 = arith.constant 0 : i32
    %c0_i32_1 = arith.constant 0 : i32
    return %c0_i32, %c0_i32_0 : i32, i32
  }
  func.func @transform_6(%arg0: i32) -> (i32, i32) {
    %c0_i32 = arith.constant 0 : i32
    %c0_i32_0 = arith.constant 0 : i32
    %c0_i32_1 = arith.constant 0 : i32
    return %c0_i32, %c0_i32_0 : i32, i32
  }
  func.func @transform_7(%arg0: i32) -> (i32, i32) {
    %c0_i32 = arith.constant 0 : i32
    %c0_i32_0 = arith.constant 0 : i32
    %c0_i32_1 = arith.constant 0 : i32
    return %c0_i32, %c0_i32_0 : i32, i32
  }
  func.func @transform_8(%arg0: i32) -> (i32, i32) {
    %c0_i32 = arith.constant 0 : i32
    %c0_i32_0 = arith.constant 0 : i32
    return %arg0, %c0_i32 : i32, i32
  }
}

</mosaic_0001>

<bundles_post_ra>
// kernel: tpu_custom_call.1
= control target key start
LH: loop header
LB: loop body
LE: loop exit
PB: predicated region body
PF: predicated region fallthrough
CT: control target
= control target key end

     0   :  { %13 = vsyncpa [#allocation3], 0  ;;  %s4590_s0 = inlined_call_operand.vmem [shape: bf16[256,16], index: 0, kind: input, shape index: {}]   ;;  %s4591_s1 = inlined_call_operand.hbm [shape: bf16[16,32], index: 1, kind: input, shape index: {}]   ;;  %s4592_s2 = inlined_call_operand.vmem [shape: bf16[32,64], index: 2, kind: input, shape index: {}]   ;;  %s4593_s3 = inlined_call_operand.hbm [shape: bf16[64,128], index: 3, kind: input, shape index: {}]   ;;  %s4594_s4 = inlined_call_operand.vmem [shape: bf16[128,256], index: 4, kind: input, shape index: {}]   ;;  %s4595_s5 = inlined_call_operand.hbm [shape: bf16[256,512], index: 5, kind: input, shape index: {}]   ;;  %s4596_s6 = inlined_call_operand.hbm [shape: bf16[512,256], index: 6, kind: input, shape index: {}]   ;;  %s4597_s7 = inlined_call_operand.vmem [shape: f32[1,1408], index: 7, kind: input, shape index: {}]   ;;  %s4598_s8 = inlined_call_operand.hbm [shape: f32[256,256], index: 8, kind: output, shape index: {}]  }
   0x1   :  { %14 = vsyncpa [#allocation6], 0 }
   0x2   :  { %15 = vsyncpa [#allocation9], 0 }
   0x3   :  { %16 = vsyncpa [#allocation4], 0 }
   0x4   :  { %18 = vsyncpa [#allocation4 + $0x1], 0  ;;  %s3854_s27 = smov 0   ;;  %s3856_s28 = smov 0  }
   0x5   :  { %s3858_s29 = smov 0   ;;  %s3860_s30 = smov 0  }
   0x6 LB: > { %s3875_s9 = sadd.s32 4294967295, %s3793_s30   ;;  %s2995_s10 = sadd.s32 4294967294, %s3793_s30   ;;  %s3793_s30 = sphi %s3860_s30, %s4616_s30   ;;  %s3789_s29 = sphi %s3858_s29, %s4615_s29   ;;  %s3785_s28 = sphi %s3856_s28, %s4614_s28   ;;  %s3781_s27 = sphi %s3854_s27, %s4613_s27  }
   0x7   : > { %s3879_s11 = sadd.s32 1, %s3793_s30   ;;  %s204_s12 = sadd.s32 1, %s3789_s29 }
   0x8   : > { %s201_s13 = ssub.s32 %s3793_s30, %s3879_s11  ;;  %p214_p0 = scmp.ne.s32.totalorder %s3789_s29, %s3785_s28 }
   0x9   : > { %p202_p1 = scmp.eq.s32.totalorder %s201_s13, 0  ;;  %p215_p2 = scmp.eq.s32.totalorder %s3875_s9, 1 }
   0xa   : > { %p220_p3 = scmp.ne.s32.totalorder %s3785_s28, %s3781_s27  ;;  %p221_p4 = scmp.eq.s32.totalorder %s2995_s10, 1 }
   0xb   : > { %s3890_s14 = scalar_select %p202_p1, %s3789_s29, %s204_s12  }
   0xc   : > { %p3892_p5 = por %p215_p2, %p214_p0  ;;  %p3896_p6 = por %p221_p4, %p220_p3 }
   0xd   : > { %p2996_p7 = scmp.ge.s32.totalorder %s3793_s30, 1  ;;  %p228_p8 = scmp.lt.s32.totalorder %s3793_s30, 3 }
   0xe   : > { %s4601_s15 = scalar_select %p3892_p5, 1, 0 }
   0xf   : > { %s4602_s16 = scalar_select %p3896_p6, 1, 0 }
  0x10   : > { %p4599_p9 = scmp.eq.s32.totalorder %s3875_s9, 0  ;;  %p3903_p10 = pnand %p2996_p7, %p228_p8 }
  0x11   : > { %s3795_s18 = smov [#allocation5]   ;;  %s3796_s21 = smov [#allocation2]  }
  0x12   : > { %p3315_p11 = pneg %p3903_p10  ;;  %s256_s19 = sshll.u32 %s3795_s18, 4  ;;  %s257_s19 = int_to_ptr.vmem [resolvable:$true] %s256_s19 }
  0x13   : > { %s240_s22 = sshll.u32 %s3796_s21, 4  ;;  %s3797_s23 = smov [#allocation7]   ;;  %s241_s22 = int_to_ptr.vmem [resolvable:$true] %s240_s22 }
  0x14   : > { %p3911_p12 = pnand %p4599_p9, %p3315_p11  ;;  %s272_s24 = sshll.u32 %s3797_s23, 4  ;;  %s273_s24 = int_to_ptr.vmem [resolvable:$true] %s272_s24 }
  0x15   : > { %s3628_s25 = scalar_lea.vmem %s257_s19, 512  ;;  %p3636_p3 = scmp.lt.s32.totalorder %s257_s19, %s257_s19 }
  0x16   : > { %p3619_p13 = pneg %p3911_p12  ;;  %p3629_p0 = scmp.ne.s32.totalorder %s257_s19, %s3628_s25 }
  0x17   : > { %p3637_p4 = scmp.lt.s32.totalorder %s3628_s25, %s3628_s25 }
  0x18   : > { %p3631_p1 = pnand %p3629_p0, %p3619_p13 }
  0x19   : > { %p3638_p7 = por %p3637_p4, %p3636_p3 }
  0x1a   : > { %p3632_p2 = pneg %p3631_p1 }
  0x1c   : > { %p3639_p8 = pnand %p3638_p7, %p3632_p2 }
  0x1e   : > { %3642 = shalt.err (!%p3639_p8)
}
  0x1f   : > { %s3798_s26 = smov 64   ;;  %s3799_s10 = smov 4  }
  0x20   : > { %3321 = dma.hbm_to_vmem [thread:$0]  (!%p3911_p12), %s4593_s3, 512, %s257_s19, [#allocation6], %s3798_s26, %s3798_s26, %s3799_s10  }
  0x21   : > { %s3654_s18 = scalar_lea.vmem %s241_s22, 128  ;;  %p3662_p9 = scmp.lt.s32.totalorder %s241_s22, %s241_s22 }
  0x22   : > { %p3655_p11 = scmp.ne.s32.totalorder %s241_s22, %s3654_s18  ;;  %p3663_p6 = scmp.lt.s32.totalorder %s3654_s18, %s3654_s18 }
  0x24   : > { %p3657_p0 = pnand %p3655_p11, %p3619_p13  ;;  %p3664_p3 = por %p3663_p6, %p3662_p9 }
  0x26   : > { %p3658_p1 = pneg %p3657_p0 }
  0x28   : > { %p3665_p2 = pnand %p3664_p3, %p3658_p1 }
  0x2a   : > { %3668 = shalt.err (!%p3665_p2)
}
  0x2b   : > { %3318 = dma.hbm_to_vmem [thread:$0]  (!%p3911_p12), %s4591_s1, 128, %s241_s22, [#allocation3], %s3798_s26, %s3798_s26, %s3799_s10  }
  0x2c   : > { %s3680_s19 = scalar_lea.vmem %s273_s24, 8192  ;;  %p3688_p11 = scmp.lt.s32.totalorder %s273_s24, %s273_s24 }
  0x2d   : > { %p3681_p4 = scmp.ne.s32.totalorder %s273_s24, %s3680_s19  ;;  %p3689_p0 = scmp.lt.s32.totalorder %s3680_s19, %s3680_s19 }
  0x2f   : > { %p3683_p7 = pnand %p3681_p4, %p3619_p13  ;;  %p3690_p5 = por %p3689_p0, %p3688_p11 }
  0x31   : > { %p3684_p8 = pneg %p3683_p7 }
  0x33   : > { %p3691_p6 = pnand %p3690_p5, %p3684_p8 }
  0x35   : > { %3694 = shalt.err (!%p3691_p6)
}
  0x36   : > { %s3800_s25 = smov 256   ;;  %s3801_s12 = smov 16  }
  0x37   : > { %3324 = dma.hbm_to_vmem [thread:$0]  (!%p3911_p12), %s4595_s5, 8192, %s273_s24, [#allocation6], %s3800_s25, %s3800_s25, %s3801_s12  }
  0x38   : > { %s3802_s22 = smov [#allocation8]  }
  0x39   : > { %s285_s26 = sshll.u32 %s3802_s22, 4  ;;  %s286_s26 = int_to_ptr.vmem [resolvable:$true] %s285_s26 }
  0x3a   : > { %s3706_s10 = scalar_lea.vmem %s286_s26, 8192  ;;  %p3714_p5 = scmp.lt.s32.totalorder %s286_s26, %s286_s26 }
  0x3b   : > { %p3707_p9 = scmp.ne.s32.totalorder %s286_s26, %s3706_s10  ;;  %p3715_p2 = scmp.lt.s32.totalorder %s3706_s10, %s3706_s10 }
  0x3d   : > { %p3709_p1 = pnand %p3707_p9, %p3619_p13  ;;  %p3716_p4 = por %p3715_p2, %p3714_p5 }
  0x3f   : > { %p3710_p3 = pneg %p3709_p1 }
  0x41   : > { %p3717_p7 = pnand %p3716_p4, %p3710_p3 }
  0x43   : > { %3720 = shalt.err (!%p3717_p7)
}
  0x44   : > { %s3803_s21 = smov 128   ;;  %s3804_s23 = smov 8  }
  0x45   : > { %3327 = dma.hbm_to_vmem [thread:$0]  (!%p3911_p12), %s4596_s6, 8192, %s286_s26, [#allocation9], %s3803_s21, %s3803_s21, %s3804_s23  }
  0x46   : > { %313 = sbr.rel (%p3903_p10) target bundleno = 1407 (0x57f), region = 52  ;;  %p4605_p8 = scmp.eq.s32.totalorder (!%p3903_p10), %s3875_s9, 0 }
  0x4b   : > { %3764 = dma.done.wait (%p4605_p8), [#allocation3], 128   ;;  %p4606_p13 = pmov %p4605_p8 }
  0x4c   : > { %p4607_p11 = pmov %p4605_p8 }
  0x4d   : > { %3766 = vsyncadd (%p4606_p13), [#allocation3], 4294967168 }
  0x4e   : > { %3768 = dma.done.wait (%p4607_p11), [#allocation6], 8704   ;;  %p4608_p0 = pmov %p4605_p8 }
  0x50   : > { %3770 = vsyncadd (%p4608_p0), [#allocation6], 4294958592  ;;  %p4609_p6 = pmov %p4608_p0 }
  0x51   : > { %p4610_p12 = pmov %p4608_p0 }
  0x52   : > { %3772 = dma.done.wait (%p4609_p6), [#allocation9], 8192  }
  0x53   : > { %3774 = vsyncadd (%p4610_p12), [#allocation9], 4294959104  ;;  %s3008_s17 = sshll.u32 %s3875_s9, 4  ;;  %v3386_v0 = vld [vmem:[#allocation2] sm:$0xff]   ;;  %vm438_vm0 = vcmask 130048   ;;  %v3395_v9 = vld [vmem:[%s4592_s2 + $0x8] sm:$0xff]  }
  0x54   : > { %p360_p10 = scmp.lt.s32.totalorder %s3008_s17, 31  ;;  %3235 = vmatprep.subr.bf16.mxu0 %v3386_v0  ;;  %3253 = vmatprep.subr.bf16.mxu1 %v3395_v9  ;;  %v3396_v10 = vld [vmem:[%s4592_s2] sm:$0xff]   ;;  %v3398_v12 = vld [vmem:[#allocation5 + $0x10] sm:$0xff]   ;;  %v3399_v13 = vld [vmem:[#allocation5 + $0x8] sm:$0xff]   ;;  %vm639_vm5 = vcmask 261120   ;;  %p4611_p1 = scmp.ne.s32.totalorder %s4601_s15, 0 }
  0x55   : > { %3236 = vmatpush3.bf16.msra.mxu0 %v3386_v0  ;;  %3254 = vmatpush3.bf16.msra.mxu1 %v3395_v9  ;;  %v3397_v11 = vld [vmem:[#allocation5 + $0x18] sm:$0xff]   ;;  %s3806_s23 = smov [#allocation10]  }
  0x56   : > { %s4618_s17 = smov (!%p360_p10, %s3008_s17), 31  ;;  %3255 = vmatprep.subr.bf16.mxu1 %v3396_v10  ;;  %3273 = vmatprep.subr.bf16.mxu0 %v3397_v11  ;;  %v3984_v14 = vld [vmem:[%s4597_s7] ss:$0 sm:$0xff]  ;;  %s3725_s19 = sshll.u32 %s3806_s23, 4  ;;  %s3726_s19 = int_to_ptr.vmem [resolvable:$false] %s3725_s19 }
  0x57   : > { %s3009_s20 = sshll.u32 %s4618_s17, 2  ;;  %s3727_s24 = scalar_lea.vmem %s3726_s19, 8192 }
  0x58   : > { %s363_s13 = scalar_lea.vmem %s4590_s0, %s3009_s20  ;;  %s356_s20 = sand.u32 1, %s3785_s28  }
  0x59   : > { %v3387_v1 = vld [vmem:[%s363_s13] sm:$0xff]   ;;  %v3388_v2 = vld [vmem:[%s363_s13 + $0x8] sm:$0xff]   ;;  %v3389_v3 = vld [vmem:[%s363_s13 + $0x10] sm:$0xff]   ;;  %3256 = vmatpush3.bf16.msra.mxu1 %v3396_v10  ;;  %s3007_s25 = sshll.u32 %s356_s20, 8 }
  0x5a   : > { %3237 = vmatprep.mubr.msk.bf16.mxu0 %vm438_vm0, %v3387_v1  ;;  %v3390_v4 = vld [vmem:[%s363_s13 + $0x18] sm:$0xff]   ;;  %v3391_v5 = vld [vmem:[%s363_s13 + $0x20] sm:$0xff]   ;;  %v3392_v6 = vld [vmem:[%s363_s13 + $0x28] sm:$0xff]   ;;  %s4475_s12 = scalar_lea.vmem [#allocation10], %s3007_s25 }
  0x5b   : > { %3238 = vmatmul.mubr.msk.bf16.vlgmr.msra.gmra.mxu0 %vm438_vm0, %v3388_v2  ;;  %v3393_v7 = vld [vmem:[%s363_s13 + $0x30] sm:$0xff]   ;;  %v3394_v8 = vld [vmem:[%s363_s13 + $0x38] sm:$0xff]   ;;  %s3203_s13 = sshll.u32 %s3875_s9, 12  ;;  %s2892_s18 = sshll.u32 %s4475_s12, 4  ;;  %s4544_s18 = int_to_ptr.vmem [resolvable:$true] %s2892_s18 }
  0x5c   : > { %3241 = vmatprep.mubr.msk.bf16.mxu0 %vm438_vm0, %v3389_v3  ;;  %3274 = vmatpush3.bf16.msra.mxu0 %v3397_v11  ;;  %s4542_s10 = scalar_lea.hbm %s4598_s8, %s3203_s13  ;;  %s4550_s9 = scalar_lea.sflag [#allocation4], %s356_s20 }
  0x5d   : > { %3275 = vmatprep.subr.bf16.mxu0 %v3398_v12  ;;  %s3721_s21 = scalar_lea.vmem %s4544_s18, 4096  ;;  %p3728_p2 = scmp.lt.s32.totalorder %s4544_s18, %s3726_s19 }
  0x5e   : > { %p3722_p9 = scmp.ne.s32.totalorder %s4544_s18, %s3721_s21  ;;  %p3729_p4 = scmp.lt.s32.totalorder %s3727_s24, %s3721_s21 }
  0x60   : > { %3276 = vmatpush3.bf16.msra.mxu0 %v3398_v12  ;;  %p3723_p3 = pnand %p3722_p9, %p4611_p1  ;;  %p3730_p7 = por %p3729_p4, %p3728_p2 }
  0x61   : > { %3277 = vmatprep.subr.bf16.mxu0 %v3399_v13 }
  0x62   : > { %p3724_p5 = pneg %p3723_p3 }
  0x63   : > { %3242 = vmatmul.mubr.msk.bf16.gmra.mxu0 %vm438_vm0, %v3390_v4 }
  0x64   : > { %3245 = vmatprep.mubr.msk.bf16.mxu0 %vm438_vm0, %v3391_v5  ;;  %3278 = vmatpush3.bf16.msra.mxu0 %v3399_v13  ;;  %p3731_p8 = pnand %p3730_p7, %p3724_p5 }
  0x6b   : > { %3246 = vmatmul.mubr.msk.bf16.gmra.mxu0 %vm438_vm0, %v3392_v6 }
  0x6c   : > { %3249 = vmatprep.mubr.msk.bf16.mxu0 %vm438_vm0, %v3393_v7 }
  0x73   : > { %3250 = vmatmul.mubr.msk.bf16.gmra.mxu0 %vm438_vm0, %v3394_v8 }
 0x11b   : > { %v3239_v15 = vpop.f32.mrf.mxu0 }
 0x11c   : > { %v506_v16 = vadd.f32 %v3239_v15, %v3984_v14 }
 0x11d   : > { %v497_v17 = vpop.f32.mrf.mxu0 }
 0x11e   : > { %v498_v18 = vadd.f32 %v3984_v14, %v497_v17  ;;  %v578_v21 = vmul.f32 0.01, %v506_v16  ;;  %vm562_vm2 = vcmp.gt.f32.partialorder %v506_v16, 0.0 }
 0x11f   : > { %v3240_v19 = vpop.f32.mrf.mxu0 }
 0x120   : > { %v509_v20 = vadd.f32 %v3240_v19, %v3984_v14  ;;  %v576_v23 = vmul.f32 0.01, %v498_v18  ;;  %vm560_vm3 = vcmp.gt.f32.partialorder %v498_v18, 0.0  ;;  %v594_v31 = vsel %vm562_vm2, %v506_v16, %v578_v21 }
 0x121   : > { %v500_v22 = vpop.f32.mrf.mxu0 }
 0x122   : > { %vm563_vm1 = vcmp.gt.f32.partialorder %v509_v20, 0.0  ;;  %v579_v24 = vmul.f32 0.01, %v509_v20  ;;  %v501_v25 = vadd.f32 %v3984_v14, %v500_v22  ;;  %v592_v33 = vsel %vm560_vm3, %v498_v18, %v576_v23 }
 0x123   : > { %v3243_v26 = vpop.f32.mrf.mxu0 }
 0x124   : > { %v595_v27 = vsel %vm563_vm1, %v509_v20, %v579_v24  ;;  %v577_v28 = vmul.f32 0.01, %v501_v25  ;;  %v522_v29 = vadd.f32 %v3243_v26, %v3984_v14  ;;  %vm561_vm4 = vcmp.gt.f32.partialorder %v501_v25, 0.0  ;;  %v3400_v24 = vld [vmem:[#allocation5] sm:$0xff]  }
 0x125   : > { %v513_v30 = vpop.f32.mrf.mxu0  ;;  %v609_v35 = vpack.c.bf16 %v595_v27, %v594_v31  ;;  %3279 = vmatprep.subr.bf16.mxu0 %v3400_v24  ;;  %v3406_v26 = vld [vmem:[%s4594_s4 + $0x64] ss:$8 sps:$4 sm:$0xff]   ;;  %v3404_v27 = vld [vmem:[%s4594_s4 + $0x60] ss:$8 sps:$4 sm:$0xff]  }
 0x126   : > { %v514_v32 = vadd.f32 %v3984_v14, %v513_v30  ;;  %v593_v34 = vsel %vm561_vm4, %v501_v25, %v577_v28  ;;  %v582_v36 = vmul.f32 0.01, %v522_v29  ;;  %vm566_vm6 = vcmp.gt.f32.partialorder %v522_v29, 0.0  ;;  %3280 = vmatpush3.bf16.msra.mxu0 %v3400_v24  ;;  %v3403_v25 = vld [vmem:[%s4594_s4 + $0x74] ss:$8 sps:$4 sm:$0xff]  }
 0x127   : > { %v3244_v37 = vpop.f32.mrf.mxu0  ;;  %v608_v38 = vpack.c.bf16 %v593_v34, %v592_v33  ;;  %1142 = vmatprep.subr.bf16.mxu1 %v3403_v25  ;;  %v3409_v28 = vld [vmem:[%s4594_s4 + $0x54] ss:$8 sps:$4 sm:$0xff]   ;;  %v3412_v30 = vld [vmem:[%s4594_s4 + $0x44] ss:$8 sps:$4 sm:$0xff]   ;;  %v3410_v31 = vld [vmem:[%s4594_s4 + $0x40] ss:$8 sps:$4 sm:$0xff]  }
 0x128   : > { %vm564_vm7 = vcmp.gt.f32.partialorder %v514_v32, 0.0  ;;  %v580_v39 = vmul.f32 0.01, %v514_v32  ;;  %v525_v40 = vadd.f32 %v3244_v37, %v3984_v14  ;;  %v598_v44 = vsel %vm566_vm6, %v522_v29, %v582_v36  ;;  %v3407_v29 = vld [vmem:[%s4594_s4 + $0x50] ss:$8 sps:$4 sm:$0xff]  }
 0x129   : > { %v516_v41 = vpop.f32.mrf.mxu0  ;;  %3257 = vmatprep.mubr.msk.bf16.mxu1 %vm639_vm5, %v608_v38  ;;  %v3413_v33 = vld [vmem:[%s4594_s4 + $0x30] ss:$8 sps:$4 sm:$0xff]   ;;  %vm856_vm6 = vcmask 523264  }
 0x12a   : > { %vm567_vm8 = vcmp.gt.f32.partialorder %v525_v40, 0.0  ;;  %v583_v42 = vmul.f32 0.01, %v525_v40  ;;  %v517_v43 = vadd.f32 %v3984_v14, %v516_v41  ;;  %3258 = vmatmul.mubr.msk.bf16.vlgmr.msra.gmra.mxu1 %vm639_vm5, %v609_v35  ;;  %v596_v45 = vsel %vm564_vm7, %v514_v32, %v580_v39  ;;  %v3415_v32 = vld [vmem:[%s4594_s4 + $0x34] ss:$8 sps:$4 sm:$0xff]  }
 0x12b   : > { %v3247_v46 = vpop.f32.mrf.mxu0  ;;  %v4043_v35 = vld [vmem:[%s4597_s7 + $0x1] ss:$0 sm:$0xff] }
 0x12c   : > { %v599_v47 = vsel %vm567_vm8, %v525_v40, %v583_v42  ;;  %vm565_vm9 = vcmp.gt.f32.partialorder %v517_v43, 0.0  ;;  %v581_v48 = vmul.f32 0.01, %v517_v43  ;;  %v538_v49 = vadd.f32 %v3247_v46, %v3984_v14 }
 0x12d   : > { %v529_v50 = vpop.f32.mrf.mxu0  ;;  %v611_v51 = vpack.c.bf16 %v599_v47, %v598_v44 }
 0x12e   : > { %v597_v52 = vsel %vm565_vm9, %v517_v43, %v581_v48  ;;  %v530_v53 = vadd.f32 %v3984_v14, %v529_v50  ;;  %v586_v55 = vmul.f32 0.01, %v538_v49  ;;  %vm570_vm10 = vcmp.gt.f32.partialorder %v538_v49, 0.0 }
 0x12f   : > { %v610_v54 = vpack.c.bf16 %v597_v52, %v596_v45  ;;  %v3248_v56 = vpop.f32.mrf.mxu0 }
 0x130   : > { %vm568_vm11 = vcmp.gt.f32.partialorder %v530_v53, 0.0  ;;  %v584_v57 = vmul.f32 0.01, %v530_v53  ;;  %v541_v58 = vadd.f32 %v3248_v56, %v3984_v14  ;;  %v602_v62 = vsel %vm570_vm10, %v538_v49, %v586_v55 }
 0x131   : > { %v532_v59 = vpop.f32.mrf.mxu0  ;;  %3261 = vmatprep.mubr.msk.bf16.mxu1 %vm639_vm5, %v610_v54 }
 0x132   : > { %vm571_vm12 = vcmp.gt.f32.partialorder %v541_v58, 0.0  ;;  %v587_v60 = vmul.f32 0.01, %v541_v58  ;;  %v533_v61 = vadd.f32 %v3984_v14, %v532_v59  ;;  %3262 = vmatmul.mubr.msk.bf16.gmra.mxu1 %vm639_vm5, %v611_v51  ;;  %v600_v63 = vsel %vm568_vm11, %v530_v53, %v584_v57 }
 0x133   : > { %v3251_v0 = vpop.f32.mrf.mxu0 }
 0x134   : > { %v603_v1 = vsel %vm571_vm12, %v541_v58, %v587_v60  ;;  %vm569_vm13 = vcmp.gt.f32.partialorder %v533_v61, 0.0  ;;  %v585_v2 = vmul.f32 0.01, %v533_v61  ;;  %v554_v3 = vadd.f32 %v3251_v0, %v3984_v14 }
 0x135   : > { %v545_v4 = vpop.f32.mrf.mxu0  ;;  %v613_v5 = vpack.c.bf16 %v603_v1, %v602_v62 }
 0x136   : > { %v601_v6 = vsel %vm569_vm13, %v533_v61, %v585_v2  ;;  %v546_v7 = vadd.f32 %v3984_v14, %v545_v4  ;;  %v590_v9 = vmul.f32 0.01, %v554_v3  ;;  %vm574_vm14 = vcmp.gt.f32.partialorder %v554_v3, 0.0 }
 0x137   : > { %v612_v8 = vpack.c.bf16 %v601_v6, %v600_v63  ;;  %v3252_v10 = vpop.f32.mrf.mxu0 }
 0x138   : > { %v588_v11 = vmul.f32 0.01, %v546_v7  ;;  %v557_v12 = vadd.f32 %v3252_v10, %v3984_v14  ;;  %vm572_vm15 = vcmp.gt.f32.partialorder %v546_v7, 0.0  ;;  %v606_v17 = vsel %vm574_vm14, %v554_v3, %v590_v9 }
 0x139   : > { %v548_v13 = vpop.f32.mrf.mxu0  ;;  %3265 = vmatprep.mubr.msk.bf16.mxu1 %vm639_vm5, %v612_v8 }
 0x13a   : > { %vm575_vm0 = vcmp.gt.f32.partialorder %v557_v12, 0.0  ;;  %v591_v15 = vmul.f32 0.01, %v557_v12  ;;  %v549_v16 = vadd.f32 %v3984_v14, %v548_v13  ;;  %3266 = vmatmul.mubr.msk.bf16.gmra.mxu1 %vm639_vm5, %v613_v5  ;;  %v604_v18 = vsel %vm572_vm15, %v546_v7, %v588_v11  ;;  %v3401_v14 = vld [vmem:[%s4594_s4 + $0x70] ss:$8 sps:$4 sm:$0xff]  }
 0x13b   : > { %1143 = vmatpush1.bf16.msra.mxu1 %v3401_v14 }
 0x13c   : > { %v607_v19 = vsel %vm575_vm0, %v557_v12, %v591_v15  ;;  %vm573_vm1 = vcmp.gt.f32.partialorder %v549_v16, 0.0  ;;  %v589_v20 = vmul.f32 0.01, %v549_v16  ;;  %1144 = vmatprep.subr.bf16.mxu1 %v3406_v26 }
 0x13d   : > { %v615_v21 = vpack.c.bf16 %v607_v19, %v606_v17 }
 0x13e   : > { %v605_v22 = vsel %vm573_vm1, %v549_v16, %v589_v20 }
 0x13f   : > { %v614_v23 = vpack.c.bf16 %v605_v22, %v604_v18  ;;  %1145 = vmatpush1.bf16.msra.mxu1 %v3404_v27 }
 0x140   : > { %1146 = vmatprep.subr.bf16.mxu1 %v3409_v28 }
 0x141   : > { %3269 = vmatprep.mubr.msk.bf16.mxu1 %vm639_vm5, %v614_v23 }
 0x142   : > { %3270 = vmatmul.mubr.msk.bf16.gmra.mxu1 %vm639_vm5, %v615_v21 }
 0x143   : > { %1147 = vmatpush1.bf16.msra.mxu1 %v3407_v29 }
 0x144   : > { %1148 = vmatprep.subr.bf16.mxu1 %v3412_v30 }
 0x147   : > { %1149 = vmatpush1.bf16.msra.mxu1 %v3410_v31 }
 0x148   : > { %1150 = vmatprep.subr.bf16.mxu1 %v3415_v32 }
 0x14b   : > { %1151 = vmatpush1.bf16.msra.mxu1 %v3413_v33 }
 0x1ea   : > { %v3259_v34 = vpop.f32.mrf.mxu1 }
 0x1eb   : > { %v707_v38 = vadd.f32 %v3259_v34, %v4043_v35 }
 0x1ec   : > { %v698_v36 = vpop.f32.mrf.mxu1 }
 0x1ed   : > { %v699_v37 = vadd.f32 %v4043_v35, %v698_v36  ;;  %v779_v45 = vmul.f32 0.01, %v707_v38  ;;  %vm763_vm4 = vcmp.gt.f32.partialorder %v707_v38, 0.0 }
 0x1ee   : > { %v3260_v39 = vpop.f32.mrf.mxu1 }
 0x1ef   : > { %v710_v40 = vadd.f32 %v3260_v39, %v4043_v35  ;;  %v777_v42 = vmul.f32 0.01, %v699_v37  ;;  %vm761_vm3 = vcmp.gt.f32.partialorder %v699_v37, 0.0  ;;  %v795_v53 = vsel %vm763_vm4, %v707_v38, %v779_v45  ;;  %v3421_v45 = vld [vmem:[%s4594_s4 + $0x14] ss:$8 sps:$4 sm:$0xff]  }
 0x1f0   : > { %v701_v41 = vpop.f32.mrf.mxu1 }
 0x1f1   : > { %vm764_vm2 = vcmp.gt.f32.partialorder %v710_v40, 0.0  ;;  %v780_v43 = vmul.f32 0.01, %v710_v40  ;;  %v702_v44 = vadd.f32 %v4043_v35, %v701_v41  ;;  %v793_v50 = vsel %vm761_vm3, %v699_v37, %v777_v42 }
 0x1f2   : > { %v3263_v46 = vpop.f32.mrf.mxu1 }
 0x1f3   : > { %vm762_vm5 = vcmp.gt.f32.partialorder %v702_v44, 0.0  ;;  %v778_v47 = vmul.f32 0.01, %v702_v44  ;;  %v796_v48 = vsel %vm764_vm2, %v710_v40, %v780_v43  ;;  %v723_v55 = vadd.f32 %v3263_v46, %v4043_v35  ;;  %v3419_v46 = vld [vmem:[%s4594_s4 + $0x10] ss:$8 sps:$4 sm:$0xff]  }
 0x1f4   : > { %v714_v49 = vpop.f32.mrf.mxu1  ;;  %v810_v57 = vpack.c.bf16 %v796_v48, %v795_v53  ;;  %v3422_v48 = vld [vmem:[%s4594_s4] ss:$8 sps:$4 sm:$0xff]   ;;  %v3433_v53 = vld [vmem:[#allocation7 + $0xc4] ss:$16 sps:$4 sm:$0xff]  }
 0x1f5   : > { %v794_v51 = vsel %vm762_vm5, %v702_v44, %v778_v47  ;;  %v715_v52 = vadd.f32 %v4043_v35, %v714_v49  ;;  %v783_v63 = vmul.f32 0.01, %v723_v55  ;;  %vm767_vm9 = vcmp.gt.f32.partialorder %v723_v55, 0.0  ;;  %v3418_v44 = vld [vmem:[%s4594_s4 + $0x24] ss:$8 sps:$4 sm:$0xff]  }
 0x1f6   : > { %v809_v54 = vpack.c.bf16 %v794_v51, %v793_v50  ;;  %v3264_v56 = vpop.f32.mrf.mxu1  ;;  %1152 = vmatprep.subr.bf16.mxu1 %v3418_v44  ;;  %v3424_v47 = vld [vmem:[%s4594_s4 + $0x4] ss:$8 sps:$4 sm:$0xff]   ;;  %v3805_v49 = vmov 0   ;;  %v3425_v50 = vld [vmem:[#allocation7 + $0xe0] ss:$16 sps:$4 sm:$0xff]  }
 0x1f7   : > { %v726_v58 = vadd.f32 %v3264_v56, %v4043_v35  ;;  %v781_v60 = vmul.f32 0.01, %v715_v52  ;;  %vm765_vm8 = vcmp.gt.f32.partialorder %v715_v52, 0.0  ;;  %v799_v8 = vsel %vm767_vm9, %v723_v55, %v783_v63  ;;  %1174 = vmatprep.mubr.bf16.mxu1 %v3805_v49  ;;  %v3427_v51 = vld [vmem:[#allocation7 + $0xe4] ss:$16 sps:$4 sm:$0xff]  }
 0x1f8   : > { %v717_v59 = vpop.f32.mrf.mxu1  ;;  %3281 = vmatprep.mubr.msk.bf16.mxu0 %vm856_vm6, %v809_v54  ;;  %1773 = vmatprep.subr.bf16.mxu0 %v3427_v51  ;;  %v3431_v54 = vld [vmem:[#allocation7 + $0xc0] ss:$16 sps:$4 sm:$0xff]   ;;  %v3439_v55 = vld [vmem:[#allocation7 + $0xa4] ss:$16 sps:$4 sm:$0xff]  }
 0x1f9   : > { %vm768_vm7 = vcmp.gt.f32.partialorder %v726_v58, 0.0  ;;  %v784_v61 = vmul.f32 0.01, %v726_v58  ;;  %v718_v62 = vadd.f32 %v4043_v35, %v717_v59  ;;  %3282 = vmatmul.mubr.msk.bf16.vlgmr.msra.gmra.mxu0 %vm856_vm6, %v810_v57  ;;  %v797_v5 = vsel %vm765_vm8, %v715_v52, %v781_v60  ;;  %v3430_v52 = vld [vmem:[#allocation7 + $0xec] ss:$16 sps:$4 sm:$0xff]  }
 0x1fa   : > { %v3267_v0 = vpop.f32.mrf.mxu1  ;;  %1774 = vmatpush1.bf16.msra.mxu0 %v3425_v50  ;;  %v3437_v56 = vld [vmem:[#allocation7 + $0xa0] ss:$16 sps:$4 sm:$0xff]   ;;  %v3445_v57 = vld [vmem:[#allocation7 + $0x84] ss:$16 sps:$4 sm:$0xff]   ;;  %v3454_v50 = vld [vmem:[#allocation7 + $0x6c] ss:$16 sps:$4 sm:$0xff]  }
 0x1fb   : > { %vm766_vm10 = vcmp.gt.f32.partialorder %v718_v62, 0.0  ;;  %v782_v1 = vmul.f32 0.01, %v718_v62  ;;  %v800_v2 = vsel %vm768_vm7, %v726_v58, %v784_v61  ;;  %v739_v3 = vadd.f32 %v3267_v0, %v4043_v35  ;;  %1775 = vmatprep.subr.bf16.mxu0 %v3433_v53  ;;  %v3443_v58 = vld [vmem:[#allocation7 + $0x80] ss:$16 sps:$4 sm:$0xff]  }
 0x1fc   : > { %v730_v4 = vpop.f32.mrf.mxu1  ;;  %v812_v11 = vpack.c.bf16 %v800_v2, %v799_v8  ;;  %v3451_v59 = vld [vmem:[#allocation7 + $0x64] ss:$16 sps:$4 sm:$0xff]   ;;  %v3449_v60 = vld [vmem:[#allocation7 + $0x60] ss:$16 sps:$4 sm:$0xff]  }
 0x1fd   : > { %v798_v6 = vsel %vm766_vm10, %v718_v62, %v782_v1  ;;  %v731_v7 = vadd.f32 %v4043_v35, %v730_v4  ;;  %v787_v15 = vmul.f32 0.01, %v739_v3  ;;  %vm771_vm12 = vcmp.gt.f32.partialorder %v739_v3, 0.0  ;;  %v3457_v61 = vld [vmem:[#allocation7 + $0x44] ss:$16 sps:$4 sm:$0xff]  }
 0x1fe   : > { %v811_v9 = vpack.c.bf16 %v798_v6, %v797_v5  ;;  %v3268_v10 = vpop.f32.mrf.mxu1  ;;  %1776 = vmatpush1.bf16.msra.mxu0 %v3431_v54  ;;  %v3455_v62 = vld [vmem:[#allocation7 + $0x40] ss:$16 sps:$4 sm:$0xff]   ;;  %v3463_v63 = vld [vmem:[#allocation7 + $0x24] ss:$16 sps:$4 sm:$0xff]  }
 0x1ff   : > { %v785_v12 = vmul.f32 0.01, %v731_v7  ;;  %v742_v13 = vadd.f32 %v3268_v10, %v4043_v35  ;;  %vm769_vm11 = vcmp.gt.f32.partialorder %v731_v7, 0.0  ;;  %v803_v23 = vsel %vm771_vm12, %v739_v3, %v787_v15  ;;  %1777 = vmatprep.subr.bf16.mxu0 %v3439_v55  ;;  %v3461_v0 = vld [vmem:[#allocation7 + $0x20] ss:$16 sps:$4 sm:$0xff]  }
 0x200   : > { %v733_v16 = vpop.f32.mrf.mxu1  ;;  %3285 = vmatprep.mubr.msk.bf16.mxu0 %vm856_vm6, %v811_v9  ;;  %v3469_v1 = vld [vmem:[#allocation7 + $0x4] ss:$16 sps:$4 sm:$0xff]   ;;  %v3467_v2 = vld [vmem:[#allocation7] ss:$16 sps:$4 sm:$0xff]   ;;  %v4091_v15 = vld [vmem:[%s4597_s7 + $0x2] ss:$0 sm:$0xff] }
 0x201   : > { %vm772_vm13 = vcmp.gt.f32.partialorder %v742_v13, 0.0  ;;  %v788_v17 = vmul.f32 0.01, %v742_v13  ;;  %v734_v18 = vadd.f32 %v4043_v35, %v733_v16  ;;  %3286 = vmatmul.mubr.msk.bf16.gmra.mxu0 %vm856_vm6, %v812_v11  ;;  %v801_v20 = vsel %vm769_vm11, %v731_v7, %v785_v12  ;;  %v3475_v3 = vld [vmem:[#allocation7 + $0x1e4] ss:$16 sps:$4 sm:$0xff]  }
 0x202   : > { %v3271_v19 = vpop.f32.mrf.mxu1  ;;  %1778 = vmatpush1.bf16.msra.mxu0 %v3437_v56  ;;  %v3473_v4 = vld [vmem:[#allocation7 + $0x1e0] ss:$16 sps:$4 sm:$0xff]   ;;  %v3481_v5 = vld [vmem:[#allocation7 + $0x1c4] ss:$16 sps:$4 sm:$0xff]   ;;  %v3452_v56 = vld [vmem:[#allocation7 + $0x68] ss:$16 sps:$4 sm:$0xff]  }
 0x203   : > { %vm770_vm14 = vcmp.gt.f32.partialorder %v734_v18, 0.0  ;;  %v786_v21 = vmul.f32 0.01, %v734_v18  ;;  %v755_v22 = vadd.f32 %v3271_v19, %v4043_v35  ;;  %v804_v24 = vsel %vm772_vm13, %v742_v13, %v788_v17  ;;  %1779 = vmatprep.subr.bf16.mxu0 %v3445_v57  ;;  %v3479_v6 = vld [vmem:[#allocation7 + $0x1c0] ss:$16 sps:$4 sm:$0xff]  }
 0x204   : > { %v746_v14 = vpop.f32.mrf.mxu1  ;;  %v814_v30 = vpack.c.bf16 %v804_v24, %v803_v23  ;;  %v3487_v7 = vld [vmem:[#allocation7 + $0x1a4] ss:$16 sps:$4 sm:$0xff]   ;;  %v3485_v8 = vld [vmem:[#allocation7 + $0x1a0] ss:$16 sps:$4 sm:$0xff]  }
 0x205   : > { %v802_v25 = vsel %vm770_vm14, %v734_v18, %v786_v21  ;;  %v747_v26 = vadd.f32 %v4043_v35, %v746_v14  ;;  %v791_v28 = vmul.f32 0.01, %v755_v22  ;;  %vm775_vm15 = vcmp.gt.f32.partialorder %v755_v22, 0.0  ;;  %v3493_v9 = vld [vmem:[#allocation7 + $0x184] ss:$16 sps:$4 sm:$0xff]  }
 0x206   : > { %v813_v27 = vpack.c.bf16 %v802_v25, %v801_v20  ;;  %v3272_v29 = vpop.f32.mrf.mxu1  ;;  %1780 = vmatpush1.bf16.msra.mxu0 %v3443_v58  ;;  %v3491_v10 = vld [vmem:[#allocation7 + $0x180] ss:$16 sps:$4 sm:$0xff]   ;;  %v3499_v11 = vld [vmem:[#allocation7 + $0x164] ss:$16 sps:$4 sm:$0xff]   ;;  %v3460_v58 = vld [vmem:[#allocation7 + $0x4c] ss:$16 sps:$4 sm:$0xff]  }
 0x207   : > { %v789_v31 = vmul.f32 0.01, %v747_v26  ;;  %v758_v32 = vadd.f32 %v3272_v29, %v4043_v35  ;;  %vm773_vm0 = vcmp.gt.f32.partialorder %v747_v26, 0.0  ;;  %v807_v37 = vsel %vm775_vm15, %v755_v22, %v791_v28  ;;  %1781 = vmatprep.subr.bf16.mxu0 %v3451_v59  ;;  %v3497_v12 = vld [vmem:[#allocation7 + $0x160] ss:$16 sps:$4 sm:$0xff]  }
 0x208   : > { %v749_v33 = vpop.f32.mrf.mxu1  ;;  %3289 = vmatprep.mubr.msk.bf16.mxu0 %vm856_vm6, %v813_v27  ;;  %v3428_v28 = vld [vmem:[#allocation7 + $0xe8] ss:$16 sps:$4 sm:$0xff]  }
 0x209   : > { %vm776_vm1 = vcmp.gt.f32.partialorder %v758_v32, 0.0  ;;  %v792_v34 = vmul.f32 0.01, %v758_v32  ;;  %v750_v36 = vadd.f32 %v4043_v35, %v749_v33  ;;  %3290 = vmatmul.mubr.msk.bf16.gmra.mxu0 %vm856_vm6, %v814_v30  ;;  %v805_v38 = vsel %vm773_vm0, %v747_v26, %v789_v31  ;;  %v3416_v35 = vld [vmem:[%s4594_s4 + $0x20] ss:$8 sps:$4 sm:$0xff]  }
 0x20a   : > { %1153 = vmatpush1.bf16.msra.mxu1 %v3416_v35  ;;  %1782 = vmatpush1.bf16.msra.mxu0 %v3449_v60  ;;  %v3436_v31 = vld [vmem:[#allocation7 + $0xcc] ss:$16 sps:$4 sm:$0xff]  }
 0x20b   : > { %v808_v39 = vsel %vm776_vm1, %v758_v32, %v792_v34  ;;  %vm774_vm2 = vcmp.gt.f32.partialorder %v750_v36, 0.0  ;;  %v790_v40 = vmul.f32 0.01, %v750_v36  ;;  %1154 = vmatprep.subr.bf16.mxu1 %v3421_v45  ;;  %1783 = vmatprep.subr.bf16.mxu0 %v3457_v61  ;;  %v3448_v35 = vld [vmem:[#allocation7 + $0x8c] ss:$16 sps:$4 sm:$0xff]  }
 0x20c   : > { %v816_v41 = vpack.c.bf16 %v808_v39, %v807_v37  ;;  %v3442_v37 = vld [vmem:[#allocation7 + $0xac] ss:$16 sps:$4 sm:$0xff]  }
 0x20d   : > { %v806_v42 = vsel %vm774_vm2, %v750_v36, %v790_v40  ;;  %v3434_v36 = vld [vmem:[#allocation7 + $0xc8] ss:$16 sps:$4 sm:$0xff]  }
 0x20e   : > { %v815_v43 = vpack.c.bf16 %v806_v42, %v805_v38  ;;  %1155 = vmatpush1.bf16.msra.mxu1 %v3419_v46  ;;  %1784 = vmatpush1.bf16.msra.mxu0 %v3455_v62  ;;  %v3458_v62 = vld [vmem:[#allocation7 + $0x48] ss:$16 sps:$4 sm:$0xff]  }
 0x20f   : > { %1156 = vmatprep.subr.bf16.mxu1 %v3424_v47  ;;  %1785 = vmatprep.subr.bf16.mxu0 %v3463_v63  ;;  %v3466_v63 = vld [vmem:[#allocation7 + $0x2c] ss:$16 sps:$4 sm:$0xff]  }
 0x210   : > { %3293 = vmatprep.mubr.msk.bf16.mxu0 %vm856_vm6, %v815_v43  ;;  %v3440_v43 = vld [vmem:[#allocation7 + $0xa8] ss:$16 sps:$4 sm:$0xff]  }
 0x211   : > { %3294 = vmatmul.mubr.msk.bf16.gmra.mxu0 %vm856_vm6, %v816_v41 }
 0x212   : > { %1157 = vmatpush1.bf16.msra.mxu1 %v3422_v48  ;;  %1786 = vmatpush1.bf16.msra.mxu0 %v3461_v0  ;;  %v3446_v48 = vld [vmem:[#allocation7 + $0x88] ss:$16 sps:$4 sm:$0xff]  }
 0x213   : > { %1886 = vmatprep.subr.bf16.mxu1 %v3430_v52  ;;  %1787 = vmatprep.subr.bf16.mxu0 %v3469_v1 }
 0x216   : > { %1788 = vmatpush1.bf16.msra.mxu0 %v3467_v2 }
 0x217   : > { %1789 = vmatprep.subr.bf16.mxu0 %v3475_v3 }
 0x21a   : > { %1790 = vmatpush2.bf16.msra.mxu0 %v3473_v4 }
 0x21b   : > { %1791 = vmatprep.subr.bf16.mxu0 %v3481_v5  ;;  %v3464_v5 = vld [vmem:[#allocation7 + $0x28] ss:$16 sps:$4 sm:$0xff]  }
 0x21e   : > { %1792 = vmatpush2.bf16.msra.mxu0 %v3479_v6 }
 0x21f   : > { %1793 = vmatprep.subr.bf16.mxu0 %v3487_v7  ;;  %v3472_v7 = vld [vmem:[#allocation7 + $0xc] ss:$16 sps:$4 sm:$0xff]  }
 0x222   : > { %1794 = vmatpush2.bf16.msra.mxu0 %v3485_v8 }
 0x223   : > { %1795 = vmatprep.subr.bf16.mxu0 %v3493_v9 }
 0x226   : > { %1796 = vmatpush2.bf16.msra.mxu0 %v3491_v10 }
 0x227   : > { %1797 = vmatprep.subr.bf16.mxu0 %v3499_v11  ;;  %v3470_v11 = vld [vmem:[#allocation7 + $0x8] ss:$16 sps:$4 sm:$0xff]  }
 0x22a   : > { %1798 = vmatpush2.bf16.msra.mxu0 %v3497_v12  ;;  %v3478_v12 = vld [vmem:[#allocation7 + $0x1ec] ss:$16 sps:$4 sm:$0xff]  }
 0x2b9   : > { %v3283_v13 = vpop.f32.mrf.mxu0 }
 0x2ba   : > { %v924_v25 = vadd.f32 %v3283_v13, %v4091_v15 }
 0x2bb   : > { %v915_v16 = vpop.f32.mrf.mxu0 }
 0x2bc   : > { %v916_v17 = vadd.f32 %v4091_v15, %v915_v16  ;;  %v996_v34 = vmul.f32 0.01, %v924_v25  ;;  %vm980_vm6 = vcmp.gt.f32.partialorder %v924_v25, 0.0 }
 0x2bd   : > { %v3284_v18 = vpop.f32.mrf.mxu0 }
 0x2be   : > { %v994_v20 = vmul.f32 0.01, %v916_v17  ;;  %vm978_vm3 = vcmp.gt.f32.partialorder %v916_v17, 0.0  ;;  %v927_v23 = vadd.f32 %v3284_v18, %v4091_v15  ;;  %v1012_v42 = vsel %vm980_vm6, %v924_v25, %v996_v34  ;;  %v3482_v25 = vld [vmem:[#allocation7 + $0x1c8] ss:$16 sps:$4 sm:$0xff]  }
 0x2bf   : > { %v918_v19 = vpop.f32.mrf.mxu0 }
 0x2c0   : > { %v919_v21 = vadd.f32 %v4091_v15, %v918_v19  ;;  %v1010_v26 = vsel %vm978_vm3, %v916_v17, %v994_v20  ;;  %v997_v32 = vmul.f32 0.01, %v927_v23  ;;  %vm981_vm5 = vcmp.gt.f32.partialorder %v927_v23, 0.0  ;;  %v3476_v20 = vld [vmem:[#allocation7 + $0x1e8] ss:$16 sps:$4 sm:$0xff]  }
 0x2c1   : > { %v3287_v22 = vpop.f32.mrf.mxu0 }
 0x2c2   : > { %vm979_vm4 = vcmp.gt.f32.partialorder %v919_v21, 0.0  ;;  %v995_v24 = vmul.f32 0.01, %v919_v21  ;;  %v1013_v39 = vsel %vm981_vm5, %v927_v23, %v997_v32  ;;  %v940_v54 = vadd.f32 %v3287_v22, %v4091_v15  ;;  %v3484_v22 = vld [vmem:[#allocation7 + $0x1cc] ss:$16 sps:$4 sm:$0xff]  }
 0x2c3   : > { %v931_v14 = vpop.f32.mrf.mxu0  ;;  %v1027_v44 = vpack.c.bf16 %v1013_v39, %v1012_v42 }
 0x2c4   : > { %v1011_v27 = vsel %vm979_vm4, %v919_v21, %v995_v24  ;;  %v932_v41 = vadd.f32 %v4091_v15, %v931_v14  ;;  %v1000_v61 = vmul.f32 0.01, %v940_v54  ;;  %vm984_vm10 = vcmp.gt.f32.partialorder %v940_v54, 0.0 }
 0x2c5   : > { %v1026_v29 = vpack.c.bf16 %v1011_v27, %v1010_v26  ;;  %v3288_v30 = vpop.f32.mrf.mxu0  ;;  %v3490_v26 = vld [vmem:[#allocation7 + $0x1ac] ss:$16 sps:$4 sm:$0xff]  }
 0x2c6   : > { %v998_v47 = vmul.f32 0.01, %v932_v41  ;;  %vm982_vm8 = vcmp.gt.f32.partialorder %v932_v41, 0.0  ;;  %v943_v51 = vadd.f32 %v3288_v30, %v4091_v15  ;;  %v1016_v4 = vsel %vm984_vm10, %v940_v54, %v1000_v61  ;;  %v3514_v54 = vld [vmem:[#allocation7 + $0x12c] ss:$16 sps:$4 sm:$0xff]  }
 0x2c7   : > { %v934_v33 = vpop.f32.mrf.mxu0  ;;  %1175 = vmatmul.mubr.bf16.vlgmr.msra.gmra.mxu1 %v1026_v29  ;;  %v3526_v61 = vld [vmem:[#allocation8 + $0x174] ss:$8 sps:$4 sm:$0xff]  }
 0x2c8   : > { %1184 = vmatprep.mubr.bf16.mxu1 %v3805_v49  ;;  %1887 = vmatpush1.bf16.msra.mxu1 %v3428_v28  ;;  %v935_v38 = vadd.f32 %v4091_v15, %v934_v33  ;;  %v1014_v55 = vsel %vm982_vm8, %v932_v41, %v998_v47  ;;  %v1001_v59 = vmul.f32 0.01, %v943_v51  ;;  %vm985_vm9 = vcmp.gt.f32.partialorder %v943_v51, 0.0  ;;  %v3496_v33 = vld [vmem:[#allocation7 + $0x18c] ss:$16 sps:$4 sm:$0xff]  }
 0x2c9   : > { %1888 = vmatprep.subr.bf16.mxu1 %v3436_v31  ;;  %v4099_v40 = vpop.f32.mrf.mxu0  ;;  %v3488_v31 = vld [vmem:[#allocation7 + $0x1a8] ss:$16 sps:$4 sm:$0xff]  }
 0x2ca   : > { %v999_v45 = vmul.f32 0.01, %v935_v38  ;;  %vm983_vm7 = vcmp.gt.f32.partialorder %v935_v38, 0.0  ;;  %v1017_v1 = vsel %vm985_vm9, %v943_v51, %v1001_v59  ;;  %v956_v18 = vadd.f32 %v4099_v40, %v4091_v15  ;;  %v3503_v51 = vld [vmem:[#allocation7 + $0x140] ss:$16 sps:$4 sm:$0xff]  }
 0x2cb   : > { %v947_v46 = vpop.f32.mrf.mxu0  ;;  %v1029_v6 = vpack.c.bf16 %v1017_v1, %v1016_v4  ;;  %v3518_v59 = vld [vmem:[#allocation7 + $0x108] ss:$16 sps:$4 sm:$0xff]  }
 0x2cc   : > { %1889 = vmatpush1.bf16.msra.mxu1 %v3434_v36  ;;  %v1015_v52 = vsel %vm983_vm7, %v935_v38, %v999_v45  ;;  %v948_v3 = vadd.f32 %v4091_v15, %v947_v46  ;;  %v1004_v14 = vmul.f32 0.01, %v956_v18  ;;  %vm988_vm14 = vcmp.gt.f32.partialorder %v956_v18, 0.0  ;;  %v3502_v38 = vld [vmem:[#allocation7 + $0x16c] ss:$16 sps:$4 sm:$0xff]  }
 0x2cd   : > { %1890 = vmatprep.subr.bf16.mxu1 %v3442_v37  ;;  %v3292_v53 = vpop.f32.mrf.mxu0  ;;  %v1028_v57 = vpack.c.bf16 %v1015_v52, %v1014_v55  ;;  %v3494_v37 = vld [vmem:[#allocation7 + $0x188] ss:$16 sps:$4 sm:$0xff]   ;;  %v3509_v55 = vld [vmem:[#allocation7 + $0x120] ss:$16 sps:$4 sm:$0xff]  }
 0x2ce   : > { %v1002_v10 = vmul.f32 0.01, %v948_v3  ;;  %vm986_vm12 = vcmp.gt.f32.partialorder %v948_v3, 0.0  ;;  %v959_v13 = vadd.f32 %v3292_v53, %v4091_v15  ;;  %v1020_v30 = vsel %vm988_vm14, %v956_v18, %v1004_v14  ;;  %v3506_v52 = vld [vmem:[#allocation7 + $0x148] ss:$16 sps:$4 sm:$0xff]  }
 0x2cf   : > { %1185 = vmatmul.mubr.bf16.gmra.mxu1 %v1027_v44  ;;  %v950_v60 = vpop.f32.mrf.mxu0  ;;  %v3511_v53 = vld [vmem:[#allocation7 + $0x124] ss:$16 sps:$4 sm:$0xff]  }
 0x2d0   : > { %1194 = vmatprep.mubr.bf16.mxu1 %v3805_v49  ;;  %1891 = vmatpush1.bf16.msra.mxu1 %v3440_v43  ;;  %v951_v0 = vadd.f32 %v4091_v15, %v950_v60  ;;  %v1018_v19 = vsel %vm986_vm12, %v948_v3, %v1002_v10  ;;  %v1005_v23 = vmul.f32 0.01, %v959_v13  ;;  %vm989_vm13 = vcmp.gt.f32.partialorder %v959_v13, 0.0  ;;  %v3500_v43 = vld [vmem:[#allocation7 + $0x168] ss:$16 sps:$4 sm:$0xff]  }
 0x2d1   : > { %1892 = vmatprep.subr.bf16.mxu1 %v3448_v35  ;;  %v3295_v2 = vpop.f32.mrf.mxu0  ;;  %v3523_v60 = vld [vmem:[#allocation8 + $0x74] ss:$8 sps:$4 sm:$0xff]  }
 0x2d2   : > { %v1003_v8 = vmul.f32 0.01, %v951_v0  ;;  %vm987_vm11 = vcmp.gt.f32.partialorder %v951_v0, 0.0  ;;  %v1021_v28 = vsel %vm989_vm13, %v959_v13, %v1005_v23  ;;  %v972_v39 = vadd.f32 %v3295_v2, %v4091_v15  ;;  %v1050_v2 = vld [vmem:[%s4597_s7 + $0x3] sm:$0x3] }
 0x2d3   : > { %v963_v9 = vpop.f32.mrf.mxu0  ;;  %v1031_v32 = vpack.c.bf16 %v1021_v28, %v1020_v30  ;;  %v3521_v28 = vld [vmem:[#allocation8 + $0x70] ss:$8 sps:$4 sm:$0xff]  }
 0x2d4   : > { %1893 = vmatpush1.bf16.msra.mxu1 %v3446_v48  ;;  %v1019_v16 = vsel %vm987_vm11, %v951_v0, %v1003_v8  ;;  %v964_v29 = vadd.f32 %v4091_v15, %v963_v9  ;;  %v1008_v35 = vmul.f32 0.01, %v972_v39  ;;  %vm992_vm1 = vcmp.gt.f32.partialorder %v972_v39, 0.0 }
 0x2d5   : > { %1894 = vmatprep.subr.bf16.mxu1 %v3454_v50  ;;  %v3296_v17 = vpop.f32.mrf.mxu0  ;;  %v1030_v21 = vpack.c.bf16 %v1019_v16, %v1018_v19  ;;  %v3505_v50 = vld [vmem:[#allocation7 + $0x144] ss:$16 sps:$4 sm:$0xff]  }
 0x2d6   : > { %v1006_v36 = vmul.f32 0.01, %v964_v29  ;;  %vm990_vm0 = vcmp.gt.f32.partialorder %v964_v29, 0.0  ;;  %v975_v40 = vadd.f32 %v3296_v17, %v4091_v15  ;;  %v1024_v46 = vsel %vm992_vm1, %v972_v39, %v1008_v35  ;;  %1799 = vmatprep.subr.bf16.mxu0 %v3505_v50  ;;  %v3538_v35 = vld [vmem:[#allocation8 + $0x154] ss:$8 sps:$4 sm:$0xff]  }
 0x2d7   : > { %1195 = vmatmul.mubr.bf16.gmra.mxu1 %v1028_v57  ;;  %v966_v24 = vpop.f32.mrf.mxu0  ;;  %1800 = vmatpush2.bf16.msra.mxu0 %v3503_v51  ;;  %v3520_v57 = vld [vmem:[#allocation7 + $0x10c] ss:$16 sps:$4 sm:$0xff]  }
 0x2d8   : > { %1204 = vmatprep.mubr.bf16.mxu1 %v3805_v49  ;;  %1895 = vmatpush1.bf16.msra.mxu1 %v3452_v56  ;;  %v967_v27 = vadd.f32 %v4091_v15, %v966_v24  ;;  %v1022_v42 = vsel %vm990_vm0, %v964_v29, %v1006_v36  ;;  %v1009_v45 = vmul.f32 0.01, %v975_v40  ;;  %vm993_vm2 = vcmp.gt.f32.partialorder %v975_v40, 0.0  ;;  %v3508_v15 = vld [vmem:[#allocation7 + $0x14c] ss:$16 sps:$4 sm:$0xff]  }
 0x2d9   : > { %1896 = vmatprep.subr.bf16.mxu1 %v3460_v58  ;;  %v3512_v56 = vld [vmem:[#allocation7 + $0x128] ss:$16 sps:$4 sm:$0xff]   ;;  %1801 = vmatprep.subr.bf16.mxu0 %v3511_v53  ;;  %v3515_v58 = vld [vmem:[#allocation7 + $0x100] ss:$16 sps:$4 sm:$0xff]  }
 0x2da   : > { %v1007_v34 = vmul.f32 0.01, %v967_v27  ;;  %vm991_vm15 = vcmp.gt.f32.partialorder %v967_v27, 0.0  ;;  %v1025_v47 = vsel %vm993_vm2, %v975_v40, %v1009_v45  ;;  %v3524_v29 = vld [vmem:[#allocation8 + $0x170] ss:$8 sps:$4 sm:$0xff]  }
 0x2db   : > { %v1033_v48 = vpack.c.bf16 %v1025_v47, %v1024_v46  ;;  %1802 = vmatpush2.bf16.msra.mxu0 %v3509_v55  ;;  %v3527_v36 = vld [vmem:[#allocation8 + $0x60] ss:$8 sps:$4 sm:$0xff]   ;;  %v3536_v55 = vld [vmem:[#allocation8 + $0x150] ss:$8 sps:$4 sm:$0xff]  }
 0x2dc   : > { %1897 = vmatpush1.bf16.msra.mxu1 %v3458_v62  ;;  %v1023_v41 = vsel %vm991_vm15, %v967_v27, %v1007_v34  ;;  %v1052_v62 = vlaneseq }
 0x2dd   : > { %1898 = vmatprep.subr.bf16.mxu1 %v3466_v63  ;;  %v1032_v44 = vpack.c.bf16 %v1023_v41, %v1022_v42 }
 0x2de   : > { %v4119_v63 = vshrl.u32 %v1052_v62, 7 }
 0x2df   : > { %1205 = vmatmul.mubr.bf16.gmra.mxu1 %v1029_v6 }
 0x2e0   : > { %1214 = vmatprep.mubr.bf16.mxu1 %v3805_v49  ;;  %1899 = vmatpush1.bf16.msra.mxu1 %v3464_v5  ;;  %v4122_v0 = vsub.s32 1, %v4119_v63  ;;  %v4125_v1 = vsub.s32 0, %v4119_v63 }
 0x2e1   : > { %1900 = vmatprep.subr.bf16.mxu1 %v3472_v7 }
 0x2e2   : > { %v4131_v3 = vrot.slane %v1050_v2, %v4122_v0  ;;  %v4134_v4 = vrot.slane %v1050_v2, %v4125_v1 }
 0x2e4   : > { %1901 = vmatpush1.bf16.msra.mxu1 %v3470_v11 }
 0x2e5   : > { %1902 = vmatprep.subr.bf16.mxu1 %v3478_v12 }
 0x2e7   : > { %1215 = vmatmul.mubr.bf16.gmra.mxu1 %v1030_v21 }
 0x2e8   : > { %1224 = vmatprep.mubr.bf16.mxu1 %v3805_v49  ;;  %1903 = vmatpush2.bf16.msra.mxu1 %v3476_v20 }
 0x2e9   : > { %1904 = vmatprep.subr.bf16.mxu1 %v3484_v22 }
 0x2ec   : > { %1905 = vmatpush2.bf16.msra.mxu1 %v3482_v25 }
 0x2ed   : > { %1906 = vmatprep.subr.bf16.mxu1 %v3490_v26 }
 0x2ef   : > { %1225 = vmatmul.mubr.bf16.gmra.mxu1 %v1031_v32  ;;  %v3529_v32 = vld [vmem:[#allocation8 + $0x64] ss:$8 sps:$4 sm:$0xff]  }
 0x2f0   : > { %1234 = vmatprep.mubr.bf16.mxu1 %v3805_v49  ;;  %1907 = vmatpush2.bf16.msra.mxu1 %v3488_v31 }
 0x2f1   : > { %1908 = vmatprep.subr.bf16.mxu1 %v3496_v33  ;;  %v3532_v33 = vld [vmem:[#allocation8 + $0x164] ss:$8 sps:$4 sm:$0xff]  }
 0x2f4   : > { %1909 = vmatpush2.bf16.msra.mxu1 %v3494_v37  ;;  %v3530_v37 = vld [vmem:[#allocation8 + $0x160] ss:$8 sps:$4 sm:$0xff]  }
 0x2f5   : > { %1910 = vmatprep.subr.bf16.mxu1 %v3502_v38 }
 0x2f7   : > { %1235 = vmatmul.mubr.bf16.gmra.mxu1 %v1032_v44 }
 0x2f8   : > { %1244 = vmatprep.mubr.bf16.mxu1 %v3805_v49  ;;  %1911 = vmatpush2.bf16.msra.mxu1 %v3500_v43  ;;  %v3517_v49 = vld [vmem:[#allocation7 + $0x104] ss:$16 sps:$4 sm:$0xff]  }
 0x2f9   : > { %1912 = vmatprep.subr.bf16.mxu1 %v3508_v15  ;;  %1803 = vmatprep.subr.bf16.mxu0 %v3517_v49  ;;  %v3535_v43 = vld [vmem:[#allocation8 + $0x54] ss:$8 sps:$4 sm:$0xff]  }
 0x2fa   : > { %1804 = vmatpush2.bf16.msra.mxu0 %v3515_v58  ;;  %v3544_v58 = vld [vmem:[#allocation8 + $0x144] ss:$8 sps:$4 sm:$0xff]  }
 0x2fb   : > { %2619 = vmatprep.subr.bf16.mxu0 %v3523_v60  ;;  %v3539_v60 = vld [vmem:[#allocation8 + $0x40] ss:$8 sps:$4 sm:$0xff]  }
 0x2fc   : > { %1913 = vmatpush2.bf16.msra.mxu1 %v3506_v52 }
 0x2fd   : > { %1914 = vmatprep.subr.bf16.mxu1 %v3514_v54  ;;  %v3533_v54 = vld [vmem:[#allocation8 + $0x50] ss:$8 sps:$4 sm:$0xff]  }
 0x2ff   : > { %1245 = vmatmul.mubr.bf16.gmra.mxu1 %v1033_v48 }
 0x300   : > { %1915 = vmatpush2.bf16.msra.mxu1 %v3512_v56 }
 0x301   : > { %1916 = vmatprep.subr.bf16.mxu1 %v3520_v57  ;;  %v3541_v57 = vld [vmem:[#allocation8 + $0x44] ss:$8 sps:$4 sm:$0xff]  }
 0x304   : > { %1917 = vmatpush2.bf16.msra.mxu1 %v3518_v59 }
 0x305   : > { %2732 = vmatprep.subr.bf16.mxu1 %v3526_v61  ;;  %v3542_v61 = vld [vmem:[#allocation8 + $0x140] ss:$8 sps:$4 sm:$0xff]  }
 0x387   : > { %v1176_v5 = vpop.f32.mrf.mxu1 }
 0x388   : > { %v1177_v8 = vadd.f32 %v1176_v5, %v4134_v4 }
 0x389   : > { %v1178_v6 = vpop.f32.mrf.mxu1 }
 0x38a   : > { %v1179_v7 = vadd.f32 %v1178_v6, %v4131_v3  ;;  %v1287_v17 = vmul.f32 0.01, %v1177_v8  ;;  %vm1255_vm5 = vcmp.gt.f32.partialorder %v1177_v8, 0.0 }
 0x38b   : > { %v1180_v9 = vpop.f32.mrf.mxu1 }
 0x38c   : > { %v1181_v10 = vadd.f32 %v1180_v9, %v4134_v4  ;;  %v1288_v12 = vmul.f32 0.01, %v1179_v7  ;;  %vm1256_vm4 = vcmp.gt.f32.partialorder %v1179_v7, 0.0  ;;  %v1319_v14 = vsel %vm1255_vm5, %v1177_v8, %v1287_v17  ;;  %v3547_v8 = vld [vmem:[#allocation8 + $0x34] ss:$8 sps:$4 sm:$0xff]  }
 0x38d   : > { %v1182_v11 = vpop.f32.mrf.mxu1 }
 0x38e   : > { %vm1257_vm3 = vcmp.gt.f32.partialorder %v1181_v10, 0.0  ;;  %v1289_v13 = vmul.f32 0.01, %v1181_v10  ;;  %v1183_v16 = vadd.f32 %v1182_v11, %v4131_v3  ;;  %v1320_v23 = vsel %vm1256_vm4, %v1179_v7, %v1288_v12 }
 0x38f   : > { %v1186_v18 = vpop.f32.mrf.mxu1 }
 0x390   : > { %vm1258_vm6 = vcmp.gt.f32.partialorder %v1183_v16, 0.0  ;;  %v1290_v19 = vmul.f32 0.01, %v1183_v16  ;;  %v1321_v20 = vsel %vm1257_vm3, %v1181_v10, %v1289_v13  ;;  %v1187_v25 = vadd.f32 %v1186_v18, %v4134_v4  ;;  %v3550_v10 = vld [vmem:[#allocation8 + $0x134] ss:$8 sps:$4 sm:$0xff]  }
 0x391   : > { %v1188_v21 = vpop.f32.mrf.mxu1  ;;  %v1351_v30 = vpack.c.bf16 %v1321_v20, %v1319_v14 }
 0x392   : > { %v1189_v22 = vadd.f32 %v1188_v21, %v4131_v3  ;;  %v1322_v24 = vsel %vm1258_vm6, %v1183_v16, %v1290_v19  ;;  %v1291_v41 = vmul.f32 0.01, %v1187_v25  ;;  %vm1259_vm9 = vcmp.gt.f32.partialorder %v1187_v25, 0.0 }
 0x393   : > { %v1190_v26 = vpop.f32.mrf.mxu1  ;;  %v1352_v27 = vpack.c.bf16 %v1322_v24, %v1320_v23  ;;  %v3548_v23 = vld [vmem:[#allocation8 + $0x130] ss:$8 sps:$4 sm:$0xff]  }
 0x394   : > { %v1191_v31 = vadd.f32 %v1190_v26, %v4134_v4  ;;  %v1292_v38 = vmul.f32 0.01, %v1189_v22  ;;  %vm1260_vm8 = vcmp.gt.f32.partialorder %v1189_v22, 0.0  ;;  %v1323_v53 = vsel %vm1259_vm9, %v1187_v25, %v1291_v41  ;;  %v3553_v25 = vld [vmem:[#allocation8 + $0x24] ss:$8 sps:$4 sm:$0xff]  }
 0x395   : > { %v1192_v34 = vpop.f32.mrf.mxu1  ;;  %1805 = vmatprep.mubr.bf16.mxu0 %v1352_v27  ;;  %1918 = vmatprep.mubr.bf16.mxu1 %v1352_v27  ;;  %v3556_v26 = vld [vmem:[#allocation8 + $0x124] ss:$8 sps:$4 sm:$0xff]  }
 0x396   : > { %vm1261_vm7 = vcmp.gt.f32.partialorder %v1191_v31, 0.0  ;;  %v1293_v39 = vmul.f32 0.01, %v1191_v31  ;;  %v1193_v40 = vadd.f32 %v1192_v34, %v4131_v3  ;;  %1806 = vmatmul.mubr.bf16.vlgmr.msra.gmra.mxu0 %v1351_v30  ;;  %1919 = vmatmul.mubr.bf16.vlgmr.msra.gmra.mxu1 %v1351_v30  ;;  %v1324_v48 = vsel %vm1260_vm8, %v1189_v22, %v1292_v38  ;;  %v3545_v22 = vld [vmem:[#allocation8 + $0x30] ss:$8 sps:$4 sm:$0xff]  }
 0x397   : > { %v1196_v42 = vpop.f32.mrf.mxu1  ;;  %2620 = vmatpush1.bf16.msra.mxu0 %v3521_v28  ;;  %2733 = vmatpush1.bf16.msra.mxu1 %v3524_v29  ;;  %v3551_v28 = vld [vmem:[#allocation8 + $0x20] ss:$8 sps:$4 sm:$0xff]   ;;  %v3562_v38 = vld [vmem:[#allocation8 + $0x114] ss:$8 sps:$4 sm:$0xff]  }
 0x398   : > { %vm1262_vm10 = vcmp.gt.f32.partialorder %v1193_v40, 0.0  ;;  %v1294_v44 = vmul.f32 0.01, %v1193_v40  ;;  %2621 = vmatprep.subr.bf16.mxu0 %v3529_v32  ;;  %2734 = vmatprep.subr.bf16.mxu1 %v3532_v33  ;;  %v1325_v46 = vsel %vm1261_vm7, %v1191_v31, %v1293_v39  ;;  %v1197_v15 = vadd.f32 %v1196_v42, %v4134_v4  ;;  %v3554_v29 = vld [vmem:[#allocation8 + $0x120] ss:$8 sps:$4 sm:$0xff]  }
 0x399   : > { %v1198_v45 = vpop.f32.mrf.mxu1  ;;  %v1353_v49 = vpack.c.bf16 %v1325_v46, %v1323_v53 }
 0x39a   : > { %v1199_v47 = vadd.f32 %v1198_v45, %v4131_v3  ;;  %v1326_v50 = vsel %vm1262_vm10, %v1193_v40, %v1294_v44  ;;  %v1295_v6 = vmul.f32 0.01, %v1197_v15  ;;  %vm1263_vm13 = vcmp.gt.f32.partialorder %v1197_v15, 0.0 }
 0x39b   : > { %v1200_v51 = vpop.f32.mrf.mxu1  ;;  %v1354_v52 = vpack.c.bf16 %v1326_v50, %v1324_v48  ;;  %2622 = vmatpush1.bf16.msra.mxu0 %v3527_v36  ;;  %2735 = vmatpush1.bf16.msra.mxu1 %v3530_v37  ;;  %v3559_v36 = vld [vmem:[#allocation8 + $0x14] ss:$8 sps:$4 sm:$0xff]   ;;  %v3560_v48 = vld [vmem:[#allocation8 + $0x110] ss:$8 sps:$4 sm:$0xff]  }
 0x39c   : > { %v1201_v56 = vadd.f32 %v1200_v51, %v4134_v4  ;;  %2623 = vmatprep.subr.bf16.mxu0 %v3535_v43  ;;  %2736 = vmatprep.subr.bf16.mxu1 %v3538_v35  ;;  %v1296_v62 = vmul.f32 0.01, %v1199_v47  ;;  %vm1264_vm12 = vcmp.gt.f32.partialorder %v1199_v47, 0.0  ;;  %v1327_v21 = vsel %vm1263_vm13, %v1197_v15, %v1295_v6  ;;  %v3565_v51 = vld [vmem:[#allocation8 + $0x4] ss:$8 sps:$4 sm:$0xff]  }
 0x39d   : > { %v1202_v59 = vpop.f32.mrf.mxu1  ;;  %1815 = vmatprep.mubr.bf16.mxu0 %v1354_v52  ;;  %1928 = vmatprep.mubr.bf16.mxu1 %v1354_v52  ;;  %v3568_v52 = vld [vmem:[#allocation8 + $0x104] ss:$8 sps:$4 sm:$0xff]  }
 0x39e   : > { %vm1265_vm11 = vcmp.gt.f32.partialorder %v1201_v56, 0.0  ;;  %v1297_v2 = vmul.f32 0.01, %v1201_v56  ;;  %v1203_v5 = vadd.f32 %v1202_v59, %v4131_v3  ;;  %1816 = vmatmul.mubr.bf16.gmra.mxu0 %v1353_v49  ;;  %1929 = vmatmul.mubr.bf16.gmra.mxu1 %v1353_v49  ;;  %v1328_v16 = vsel %vm1264_vm12, %v1199_v47, %v1296_v62  ;;  %v3557_v47 = vld [vmem:[#allocation8 + $0x10] ss:$8 sps:$4 sm:$0xff]  }
 0x39f   : > { %v1206_v7 = vpop.f32.mrf.mxu1  ;;  %2624 = vmatpush1.bf16.msra.mxu0 %v3533_v54  ;;  %2737 = vmatpush1.bf16.msra.mxu1 %v3536_v55  ;;  %v3563_v54 = vld [vmem:[#allocation8] ss:$8 sps:$4 sm:$0xff]   ;;  %v3574_v62 = vld [vmem:[#allocation8 + $0x1f4] ss:$8 sps:$4 sm:$0xff]  }
 0x3a0   : > { %vm1266_vm14 = vcmp.gt.f32.partialorder %v1203_v5, 0.0  ;;  %v1298_v9 = vmul.f32 0.01, %v1203_v5  ;;  %2625 = vmatprep.subr.bf16.mxu0 %v3541_v57  ;;  %2738 = vmatprep.subr.bf16.mxu1 %v3544_v58  ;;  %v1329_v12 = vsel %vm1265_vm11, %v1201_v56, %v1297_v2  ;;  %v1207_v18 = vadd.f32 %v1206_v7, %v4134_v4  ;;  %v3566_v55 = vld [vmem:[#allocation8 + $0x100] ss:$8 sps:$4 sm:$0xff]  }
 0x3a1   : > { %v1208_v11 = vpop.f32.mrf.mxu1  ;;  %v1355_v14 = vpack.c.bf16 %v1329_v12, %v1327_v21 }
 0x3a2   : > { %v1209_v13 = vadd.f32 %v1208_v11, %v4131_v3  ;;  %v1330_v17 = vsel %vm1266_vm14, %v1203_v5, %v1298_v9  ;;  %v1299_v33 = vmul.f32 0.01, %v1207_v18  ;;  %vm1267_vm1 = vcmp.gt.f32.partialorder %v1207_v18, 0.0 }
 0x3a3   : > { %v1210_v19 = vpop.f32.mrf.mxu1  ;;  %v1356_v20 = vpack.c.bf16 %v1330_v17, %v1328_v16  ;;  %2626 = vmatpush1.bf16.msra.mxu0 %v3539_v60  ;;  %2739 = vmatpush1.bf16.msra.mxu1 %v3542_v61  ;;  %v3571_v60 = vld [vmem:[#allocation8 + $0xf4] ss:$8 sps:$4 sm:$0xff]   ;;  %v3572_v16 = vld [vmem:[#allocation8 + $0x1f0] ss:$8 sps:$4 sm:$0xff]  }
 0x3a4   : > { %v1211_v24 = vadd.f32 %v1210_v19, %v4134_v4  ;;  %2627 = vmatprep.subr.bf16.mxu0 %v3547_v8  ;;  %2740 = vmatprep.subr.bf16.mxu1 %v3550_v10  ;;  %v1300_v30 = vmul.f32 0.01, %v1209_v13  ;;  %vm1268_vm0 = vcmp.gt.f32.partialorder %v1209_v13, 0.0  ;;  %v1331_v46 = vsel %vm1267_vm1, %v1207_v18, %v1299_v33  ;;  %v3577_v19 = vld [vmem:[#allocation8 + $0xe4] ss:$8 sps:$4 sm:$0xff]  }
 0x3a5   : > { %v1212_v27 = vpop.f32.mrf.mxu1  ;;  %1825 = vmatprep.mubr.bf16.mxu0 %v1356_v20  ;;  %1938 = vmatprep.mubr.bf16.mxu1 %v1356_v20  ;;  %v3580_v20 = vld [vmem:[#allocation8 + $0x1e4] ss:$8 sps:$4 sm:$0xff]  }
 0x3a6   : > { %vm1269_vm15 = vcmp.gt.f32.partialorder %v1211_v24, 0.0  ;;  %v1301_v31 = vmul.f32 0.01, %v1211_v24  ;;  %v1213_v32 = vadd.f32 %v1212_v27, %v4131_v3  ;;  %1826 = vmatmul.mubr.bf16.gmra.mxu0 %v1355_v14  ;;  %1939 = vmatmul.mubr.bf16.gmra.mxu1 %v1355_v14  ;;  %v1332_v42 = vsel %vm1268_vm0, %v1209_v13, %v1300_v30  ;;  %v3569_v13 = vld [vmem:[#allocation8 + $0xf0] ss:$8 sps:$4 sm:$0xff]  }
 0x3a7   : > { %v1216_v34 = vpop.f32.mrf.mxu1  ;;  %2628 = vmatpush1.bf16.msra.mxu0 %v3545_v22  ;;  %2741 = vmatpush1.bf16.msra.mxu1 %v3548_v23  ;;  %v3575_v22 = vld [vmem:[#allocation8 + $0xe0] ss:$8 sps:$4 sm:$0xff]   ;;  %v3586_v30 = vld [vmem:[#allocation8 + $0x1d4] ss:$8 sps:$4 sm:$0xff]  }
 0x3a8   : > { %vm1270_vm2 = vcmp.gt.f32.partialorder %v1213_v32, 0.0  ;;  %v1302_v37 = vmul.f32 0.01, %v1213_v32  ;;  %2629 = vmatprep.subr.bf16.mxu0 %v3553_v25  ;;  %2742 = vmatprep.subr.bf16.mxu1 %v3556_v26  ;;  %v1333_v40 = vsel %vm1269_vm15, %v1211_v24, %v1301_v31  ;;  %v1217_v44 = vadd.f32 %v1216_v34, %v4134_v4  ;;  %v3578_v23 = vld [vmem:[#allocation8 + $0x1e0] ss:$8 sps:$4 sm:$0xff]  }
 0x3a9   : > { %v1218_v39 = vpop.f32.mrf.mxu1  ;;  %v1357_v15 = vpack.c.bf16 %v1333_v40, %v1331_v46 }
 0x3aa   : > { %v1219_v41 = vadd.f32 %v1218_v39, %v4131_v3  ;;  %v1334_v43 = vsel %vm1270_vm2, %v1213_v32, %v1302_v37  ;;  %v1303_v58 = vmul.f32 0.01, %v1217_v44  ;;  %vm1271_vm5 = vcmp.gt.f32.partialorder %v1217_v44, 0.0 }
 0x3ab   : > { %v1220_v35 = vpop.f32.mrf.mxu1  ;;  %v1358_v45 = vpack.c.bf16 %v1334_v43, %v1332_v42  ;;  %2630 = vmatpush1.bf16.msra.mxu0 %v3551_v28  ;;  %2743 = vmatpush1.bf16.msra.mxu1 %v3554_v29  ;;  %v3583_v28 = vld [vmem:[#allocation8 + $0xd4] ss:$8 sps:$4 sm:$0xff]   ;;  %v3584_v42 = vld [vmem:[#allocation8 + $0x1d0] ss:$8 sps:$4 sm:$0xff]  }
 0x3ac   : > { %v1221_v50 = vadd.f32 %v1220_v35, %v4134_v4  ;;  %2631 = vmatprep.subr.bf16.mxu0 %v3559_v36  ;;  %2744 = vmatprep.subr.bf16.mxu1 %v3562_v38  ;;  %v1304_v56 = vmul.f32 0.01, %v1219_v41  ;;  %vm1272_vm4 = vcmp.gt.f32.partialorder %v1219_v41, 0.0  ;;  %v1335_v12 = vsel %vm1271_vm5, %v1217_v44, %v1303_v58  ;;  %v3589_v35 = vld [vmem:[#allocation8 + $0xc4] ss:$8 sps:$4 sm:$0xff]  }
 0x3ad   : > { %v1222_v53 = vpop.f32.mrf.mxu1  ;;  %1835 = vmatprep.mubr.bf16.mxu0 %v1358_v45  ;;  %1948 = vmatprep.mubr.bf16.mxu1 %v1358_v45  ;;  %v3592_v45 = vld [vmem:[#allocation8 + $0x1c4] ss:$8 sps:$4 sm:$0xff]  }
 0x3ae   : > { %vm1273_vm3 = vcmp.gt.f32.partialorder %v1221_v50, 0.0  ;;  %v1305_v49 = vmul.f32 0.01, %v1221_v50  ;;  %v1223_v57 = vadd.f32 %v1222_v53, %v4131_v3  ;;  %1836 = vmatmul.mubr.bf16.gmra.mxu0 %v1357_v15  ;;  %1949 = vmatmul.mubr.bf16.gmra.mxu1 %v1357_v15  ;;  %v1336_v7 = vsel %vm1272_vm4, %v1219_v41, %v1304_v56  ;;  %v3581_v41 = vld [vmem:[#allocation8 + $0xd0] ss:$8 sps:$4 sm:$0xff]  }
 0x3af   : > { %v1226_v59 = vpop.f32.mrf.mxu1  ;;  %2632 = vmatpush1.bf16.msra.mxu0 %v3557_v47  ;;  %2745 = vmatpush1.bf16.msra.mxu1 %v3560_v48  ;;  %v3587_v47 = vld [vmem:[#allocation8 + $0xc0] ss:$8 sps:$4 sm:$0xff]   ;;  %v3598_v56 = vld [vmem:[#allocation8 + $0x1b4] ss:$8 sps:$4 sm:$0xff]  }
 0x3b0   : > { %vm1274_vm6 = vcmp.gt.f32.partialorder %v1223_v57, 0.0  ;;  %v1306_v61 = vmul.f32 0.01, %v1223_v57  ;;  %2633 = vmatprep.subr.bf16.mxu0 %v3565_v51  ;;  %2746 = vmatprep.subr.bf16.mxu1 %v3568_v52  ;;  %v1337_v5 = vsel %vm1273_vm3, %v1221_v50, %v1305_v49  ;;  %v1227_v9 = vadd.f32 %v1226_v59, %v4134_v4  ;;  %v3590_v48 = vld [vmem:[#allocation8 + $0x1c0] ss:$8 sps:$4 sm:$0xff]  }
 0x3b1   : > { %v1228_v2 = vpop.f32.mrf.mxu1  ;;  %v1359_v18 = vpack.c.bf16 %v1337_v5, %v1335_v12 }
 0x3b2   : > { %v1229_v6 = vadd.f32 %v1228_v2, %v4131_v3  ;;  %v1338_v8 = vsel %vm1274_vm6, %v1223_v57, %v1306_v61  ;;  %v1307_v26 = vmul.f32 0.01, %v1227_v9  ;;  %vm1275_vm9 = vcmp.gt.f32.partialorder %v1227_v9, 0.0 }
 0x3b3   : > { %v1230_v10 = vpop.f32.mrf.mxu1  ;;  %v1360_v11 = vpack.c.bf16 %v1338_v8, %v1336_v7  ;;  %2634 = vmatpush1.bf16.msra.mxu0 %v3563_v54  ;;  %2747 = vmatpush1.bf16.msra.mxu1 %v3566_v55  ;;  %v3595_v54 = vld [vmem:[#allocation8 + $0xb4] ss:$8 sps:$4 sm:$0xff]   ;;  %v3596_v7 = vld [vmem:[#allocation8 + $0x1b0] ss:$8 sps:$4 sm:$0xff]  }
 0x3b4   : > { %v1231_v17 = vadd.f32 %v1230_v10, %v4134_v4  ;;  %2635 = vmatprep.subr.bf16.mxu0 %v3571_v60  ;;  %2748 = vmatprep.subr.bf16.mxu1 %v3574_v62  ;;  %v1308_v24 = vmul.f32 0.01, %v1229_v6  ;;  %vm1276_vm8 = vcmp.gt.f32.partialorder %v1229_v6, 0.0  ;;  %v1339_v40 = vsel %vm1275_vm9, %v1227_v9, %v1307_v26  ;;  %v3610_v26 = vld [vmem:[#allocation8 + $0x194] ss:$8 sps:$4 sm:$0xff]  }
 0x3b5   : > { %v1232_v21 = vpop.f32.mrf.mxu1  ;;  %1845 = vmatprep.mubr.bf16.mxu0 %v1360_v11  ;;  %1958 = vmatprep.mubr.bf16.mxu1 %v1360_v11 }
 0x3b6   : > { %vm1277_vm7 = vcmp.gt.f32.partialorder %v1231_v17, 0.0  ;;  %v1309_v14 = vmul.f32 0.01, %v1231_v17  ;;  %v1233_v25 = vadd.f32 %v1232_v21, %v4131_v3  ;;  %1846 = vmatmul.mubr.bf16.gmra.mxu0 %v1359_v18  ;;  %1959 = vmatmul.mubr.bf16.gmra.mxu1 %v1359_v18  ;;  %v1340_v34 = vsel %vm1276_vm8, %v1229_v6, %v1308_v24  ;;  %v3593_v6 = vld [vmem:[#allocation8 + $0xb0] ss:$8 sps:$4 sm:$0xff]  }
 0x3b7   : > { %v1236_v27 = vpop.f32.mrf.mxu1  ;;  %2636 = vmatpush2.bf16.msra.mxu0 %v3569_v13  ;;  %2749 = vmatpush2.bf16.msra.mxu1 %v3572_v16  ;;  %v3599_v24 = vld [vmem:[#allocation8 + $0xa0] ss:$8 sps:$4 sm:$0xff]  }
 0x3b8   : > { %vm1278_vm10 = vcmp.gt.f32.partialorder %v1233_v25, 0.0  ;;  %v1310_v29 = vmul.f32 0.01, %v1233_v25  ;;  %2637 = vmatprep.subr.bf16.mxu0 %v3577_v19  ;;  %2750 = vmatprep.subr.bf16.mxu1 %v3580_v20  ;;  %v1341_v32 = vsel %vm1277_vm7, %v1231_v17, %v1309_v14  ;;  %v1237_v37 = vadd.f32 %v1236_v27, %v4134_v4  ;;  %v3602_v14 = vld [vmem:[#allocation8 + $0x1a0] ss:$8 sps:$4 sm:$0xff]  }
 0x3b9   : > { %v1238_v31 = vpop.f32.mrf.mxu1  ;;  %v1361_v44 = vpack.c.bf16 %v1341_v32, %v1339_v40  ;;  %v3605_v27 = vld [vmem:[#allocation8 + $0x90] ss:$8 sps:$4 sm:$0xff]   ;;  %v3614_v32 = vld [vmem:[#allocation8 + $0x180] ss:$8 sps:$4 sm:$0xff]  }
 0x3ba   : > { %v1239_v33 = vadd.f32 %v1238_v31, %v4131_v3  ;;  %v1342_v36 = vsel %vm1278_vm10, %v1233_v25, %v1310_v29  ;;  %v1311_v52 = vmul.f32 0.01, %v1237_v37  ;;  %vm1279_vm13 = vcmp.gt.f32.partialorder %v1237_v37, 0.0  ;;  %v3607_v25 = vld [vmem:[#allocation8 + $0x94] ss:$8 sps:$4 sm:$0xff]  }
 0x3bb   : > { %v1240_v38 = vpop.f32.mrf.mxu1  ;;  %v1362_v39 = vpack.c.bf16 %v1342_v36, %v1340_v34  ;;  %2638 = vmatpush2.bf16.msra.mxu0 %v3575_v22  ;;  %2751 = vmatpush2.bf16.msra.mxu1 %v3578_v23  ;;  %v3604_v23 = vld [vmem:[#allocation8 + $0x1a4] ss:$8 sps:$4 sm:$0xff]   ;;  %v3611_v31 = vld [vmem:[#allocation8 + $0x80] ss:$8 sps:$4 sm:$0xff]   ;;  %v1443_v34 = vsub.s32 2, %v4119_v63  ;;  %v1447_v36 = vsub.s32 3, %v4119_v63 }
 0x3bc   : > { %v1241_v43 = vadd.f32 %v1240_v38, %v4134_v4  ;;  %2639 = vmatprep.subr.bf16.mxu0 %v3583_v28  ;;  %2752 = vmatprep.subr.bf16.mxu1 %v3586_v30  ;;  %v1312_v50 = vmul.f32 0.01, %v1239_v33  ;;  %vm1280_vm12 = vcmp.gt.f32.partialorder %v1239_v33, 0.0  ;;  %v1343_v5 = vsel %vm1279_vm13, %v1237_v37, %v1311_v52  ;;  %v3608_v28 = vld [vmem:[#allocation8 + $0x190] ss:$8 sps:$4 sm:$0xff]  }
 0x3bd   : > { %v1242_v46 = vpop.f32.mrf.mxu1  ;;  %1855 = vmatprep.mubr.bf16.mxu0 %v1362_v39  ;;  %1968 = vmatprep.mubr.bf16.mxu1 %v1362_v39  ;;  %v3613_v29 = vld [vmem:[#allocation8 + $0x84] ss:$8 sps:$4 sm:$0xff]  }
 0x3be   : > { %vm1281_vm11 = vcmp.gt.f32.partialorder %v1241_v43, 0.0  ;;  %v1313_v15 = vmul.f32 0.01, %v1241_v43  ;;  %v1243_v51 = vadd.f32 %v1242_v46, %v4131_v3  ;;  %1856 = vmatmul.mubr.bf16.gmra.mxu0 %v1361_v44  ;;  %1969 = vmatmul.mubr.bf16.gmra.mxu1 %v1361_v44  ;;  %v1344_v59 = vsel %vm1280_vm12, %v1239_v33, %v1312_v50  ;;  %v3616_v30 = vld [vmem:[#allocation8 + $0x184] ss:$8 sps:$4 sm:$0xff]  }
 0x3bf   : > { %v1246_v53 = vpop.f32.mrf.mxu1  ;;  %2640 = vmatpush2.bf16.msra.mxu0 %v3581_v41  ;;  %2753 = vmatpush2.bf16.msra.mxu1 %v3584_v42  ;;  %v1431_v33 = vld [vmem:[%s4597_s7 + $0x5] sm:$0xf] }
 0x3c0   : > { %vm1282_vm14 = vcmp.gt.f32.partialorder %v1243_v51, 0.0  ;;  %v1314_v55 = vmul.f32 0.01, %v1243_v51  ;;  %2641 = vmatprep.subr.bf16.mxu0 %v3589_v35  ;;  %2754 = vmatprep.subr.bf16.mxu1 %v3592_v45  ;;  %v1345_v57 = vsel %vm1281_vm11, %v1241_v43, %v1313_v15  ;;  %v1247_v61 = vadd.f32 %v1246_v53, %v4134_v4 }
 0x3c1   : > { %v1248_v49 = vpop.f32.mrf.mxu1  ;;  %v1363_v9 = vpack.c.bf16 %v1345_v57, %v1343_v5  ;;  %v4180_v37 = vrot.slane %v1431_v33, %v4125_v1  ;;  %v4182_v39 = vrot.slane %v1431_v33, %v1443_v34  ;;  %v4185_v41 = vrot.slane %v1431_v33, %v4122_v0 }
 0x3c2   : > { %v1249_v58 = vadd.f32 %v1248_v49, %v4131_v3  ;;  %v1346_v60 = vsel %vm1282_vm14, %v1243_v51, %v1314_v55  ;;  %v1315_v16 = vmul.f32 0.01, %v1247_v61  ;;  %vm1283_vm1 = vcmp.gt.f32.partialorder %v1247_v61, 0.0 }
 0x3c3   : > { %v1250_v62 = vpop.f32.mrf.mxu1  ;;  %v1364_v2 = vpack.c.bf16 %v1346_v60, %v1344_v59  ;;  %2642 = vmatpush2.bf16.msra.mxu0 %v3587_v47  ;;  %2755 = vmatpush2.bf16.msra.mxu1 %v3590_v48  ;;  %v4187_v42 = vrot.slane %v1431_v33, %v1447_v36 }
 0x3c4   : > { %v1251_v8 = vadd.f32 %v1250_v62, %v4134_v4  ;;  %2643 = vmatprep.subr.bf16.mxu0 %v3595_v54  ;;  %2756 = vmatprep.subr.bf16.mxu1 %v3598_v56  ;;  %v1316_v11 = vmul.f32 0.01, %v1249_v58  ;;  %vm1284_vm0 = vcmp.gt.f32.partialorder %v1249_v58, 0.0  ;;  %v1347_v21 = vsel %vm1283_vm1, %v1247_v61, %v1315_v16 }
 0x3c5   : > { %v1252_v10 = vpop.f32.mrf.mxu1  ;;  %1865 = vmatprep.mubr.bf16.mxu0 %v1364_v2  ;;  %1978 = vmatprep.mubr.bf16.mxu1 %v1364_v2 }
 0x3c6   : > { %vm1285_vm15 = vcmp.gt.f32.partialorder %v1251_v8, 0.0  ;;  %v1317_v12 = vmul.f32 0.01, %v1251_v8  ;;  %v1253_v13 = vadd.f32 %v1252_v10, %v4131_v3  ;;  %1866 = vmatmul.mubr.bf16.gmra.mxu0 %v1363_v9  ;;  %1979 = vmatmul.mubr.bf16.gmra.mxu1 %v1363_v9  ;;  %v1348_v18 = vsel %vm1284_vm0, %v1249_v58, %v1316_v11  ;;  %v3601_v3 = vld [vmem:[#allocation8 + $0xa4] ss:$8 sps:$4 sm:$0xff]  }
 0x3c7   : > { %2644 = vmatpush2.bf16.msra.mxu0 %v3593_v6  ;;  %2757 = vmatpush2.bf16.msra.mxu1 %v3596_v7 }
 0x3c8   : > { %vm1286_vm2 = vcmp.gt.f32.partialorder %v1253_v13, 0.0  ;;  %v1318_v4 = vmul.f32 0.01, %v1253_v13  ;;  %v1349_v17 = vsel %vm1285_vm15, %v1251_v8, %v1317_v12  ;;  %2645 = vmatprep.subr.bf16.mxu0 %v3601_v3  ;;  %2758 = vmatprep.subr.bf16.mxu1 %v3604_v23 }
 0x3c9   : > { %v1365_v22 = vpack.c.bf16 %v1349_v17, %v1347_v21 }
 0x3ca   : > { %v1350_v19 = vsel %vm1286_vm2, %v1253_v13, %v1318_v4 }
 0x3cb   : > { %v1366_v20 = vpack.c.bf16 %v1350_v19, %v1348_v18  ;;  %2646 = vmatpush2.bf16.msra.mxu0 %v3599_v24  ;;  %2759 = vmatpush2.bf16.msra.mxu1 %v3602_v14 }
 0x3cc   : > { %2647 = vmatprep.subr.bf16.mxu0 %v3607_v25  ;;  %2760 = vmatprep.subr.bf16.mxu1 %v3610_v26 }
 0x3cd   : > { %1875 = vmatprep.mubr.bf16.mxu0 %v1366_v20  ;;  %1988 = vmatprep.mubr.bf16.mxu1 %v1366_v20 }
 0x3ce   : > { %1876 = vmatmul.mubr.bf16.gmra.mxu0 %v1365_v22  ;;  %1989 = vmatmul.mubr.bf16.gmra.mxu1 %v1365_v22 }
 0x3cf   : > { %2648 = vmatpush2.bf16.msra.mxu0 %v3605_v27  ;;  %2761 = vmatpush2.bf16.msra.mxu1 %v3608_v28 }
 0x3d0   : > { %2649 = vmatprep.subr.bf16.mxu0 %v3613_v29  ;;  %2762 = vmatprep.subr.bf16.mxu1 %v3616_v30 }
 0x3d3   : > { %2650 = vmatpush2.bf16.msra.mxu0 %v3611_v31  ;;  %2763 = vmatpush2.bf16.msra.mxu1 %v3614_v32 }
 0x456   : > { %v1807_v38 = vpop.f32.mrf.mxu0  ;;  %v1920_v40 = vpop.f32.mrf.mxu1 }
 0x457   : > { %v1808_v35 = vadd.f32 %v1807_v38, %v4180_v37  ;;  %v1921_v45 = vadd.f32 %v1920_v40, %v4182_v39 }
 0x458   : > { %v1809_v43 = vpop.f32.mrf.mxu0  ;;  %v1922_v44 = vpop.f32.mrf.mxu1 }
 0x459   : > { %v1810_v47 = vadd.f32 %v1809_v43, %v4185_v41  ;;  %v1923_v48 = vadd.f32 %v1922_v44, %v4187_v42  ;;  %vm1999_vm3 = vcmp.gt.f32.partialorder %v1808_v35, 0.0  ;;  %v2063_v53 = vmul.f32 0.01, %v1808_v35 }
 0x45a   : > { %v1811_v46 = vpop.f32.mrf.mxu0  ;;  %v1924_v63 = vpop.f32.mrf.mxu1  ;;  %v2065_v54 = vmul.f32 0.01, %v1921_v45  ;;  %vm2001_vm4 = vcmp.gt.f32.partialorder %v1921_v45, 0.0 }
 0x45b   : > { %v1812_v50 = vadd.f32 %v1811_v46, %v4180_v37  ;;  %v1925_v15 = vadd.f32 %v1924_v63, %v4182_v39  ;;  %v2064_v59 = vmul.f32 0.01, %v1810_v47  ;;  %v2066_v60 = vmul.f32 0.01, %v1923_v48 }
 0x45c   : > { %v1813_v51 = vpop.f32.mrf.mxu0  ;;  %v1926_v52 = vpop.f32.mrf.mxu1  ;;  %vm2000_vm6 = vcmp.gt.f32.partialorder %v1810_v47, 0.0  ;;  %vm2002_vm8 = vcmp.gt.f32.partialorder %v1923_v48, 0.0  ;;  %v2127_v7 = vsel %vm1999_vm3, %v1808_v35, %v2063_v53  ;;  %v2129_v13 = vsel %vm2001_vm4, %v1921_v45, %v2065_v54 }
 0x45d   : > { %v2067_v55 = vmul.f32 0.01, %v1812_v50  ;;  %v1814_v56 = vadd.f32 %v1813_v51, %v4185_v41  ;;  %v1927_v49 = vadd.f32 %v1926_v52, %v4187_v42  ;;  %vm2003_vm5 = vcmp.gt.f32.partialorder %v1812_v50, 0.0 }
 0x45e   : > { %v1817_v57 = vpop.f32.mrf.mxu0  ;;  %v1930_v58 = vpop.f32.mrf.mxu1  ;;  %v2069_v61 = vmul.f32 0.01, %v1925_v15  ;;  %vm2005_vm9 = vcmp.gt.f32.partialorder %v1925_v15, 0.0  ;;  %v2128_v16 = vsel %vm2000_vm6, %v1810_v47, %v2064_v59  ;;  %v2130_v3 = vsel %vm2002_vm8, %v1923_v48, %v2066_v60 }
 0x45f   : > { %vm2004_vm7 = vcmp.gt.f32.partialorder %v1814_v56, 0.0  ;;  %v2068_v62 = vmul.f32 0.01, %v1814_v56  ;;  %vm2006_vm10 = vcmp.gt.f32.partialorder %v1927_v49, 0.0  ;;  %v2070_v6 = vmul.f32 0.01, %v1927_v49 }
 0x460   : > { %v1819_v2 = vpop.f32.mrf.mxu0  ;;  %v1932_v5 = vpop.f32.mrf.mxu1  ;;  %v2131_v8 = vsel %vm2003_vm5, %v1812_v50, %v2067_v55  ;;  %v2133_v18 = vsel %vm2005_vm9, %v1925_v15, %v2069_v61  ;;  %v1818_v19 = vadd.f32 %v1817_v57, %v4180_v37  ;;  %v4205_v20 = vadd.f32 %v1930_v58, %v4182_v39 }
 0x461   : > { %v1820_v9 = vadd.f32 %v1819_v2, %v4185_v41  ;;  %v1933_v10 = vadd.f32 %v1932_v5, %v4187_v42  ;;  %v2132_v4 = vsel %vm2004_vm7, %v1814_v56, %v2068_v62  ;;  %v2134_v17 = vsel %vm2006_vm10, %v1927_v49, %v2070_v6 }
 0x462   : > { %v1821_v11 = vpop.f32.mrf.mxu0  ;;  %v1934_v12 = vpop.f32.mrf.mxu1  ;;  %v2191_v23 = vpack.c.bf16 %v2131_v8, %v2127_v7  ;;  %v2192_v28 = vpack.c.bf16 %v2132_v4, %v2128_v16  ;;  %v2194_v29 = vpack.c.bf16 %v2134_v17, %v2130_v3  ;;  %v2193_v32 = vpack.c.bf16 %v2133_v18, %v2129_v13 }
 0x463   : > { %v2072_v24 = vmul.f32 0.01, %v1820_v9  ;;  %v2074_v14 = vmul.f32 0.01, %v1933_v10  ;;  %v1822_v25 = vadd.f32 %v1821_v11, %v4180_v37  ;;  %vm2008_vm11 = vcmp.gt.f32.partialorder %v1820_v9, 0.0 }
 0x464   : > { %v1823_v21 = vpop.f32.mrf.mxu0  ;;  %v1936_v22 = vpop.f32.mrf.mxu1  ;;  %vm2010_vm12 = vcmp.gt.f32.partialorder %v1933_v10, 0.0  ;;  %v1935_v33 = vadd.f32 %v1934_v12, %v4182_v39  ;;  %2651 = vmatprep.mubr.bf16.mxu0 %v2192_v28  ;;  %2764 = vmatprep.mubr.bf16.mxu1 %v2194_v29  ;;  %vm2007_vm15 = vcmp.gt.f32.partialorder %v1818_v19, 0.0  ;;  %v2071_v43 = vmul.f32 0.01, %v1818_v19 }
 0x465   : > { %v1824_v26 = vadd.f32 %v1823_v21, %v4185_v41  ;;  %v1937_v27 = vadd.f32 %v1936_v22, %v4187_v42  ;;  %v2075_v44 = vmul.f32 0.01, %v1822_v25  ;;  %2652 = vmatmul.mubr.bf16.vlgmr.msra.gmra.mxu0 %v2191_v23  ;;  %2765 = vmatmul.mubr.bf16.vlgmr.msra.gmra.mxu1 %v2193_v32  ;;  %v2136_v46 = vsel %vm2008_vm11, %v1820_v9, %v2072_v24 }
 0x466   : > { %v1827_v30 = vpop.f32.mrf.mxu0  ;;  %v1940_v31 = vpop.f32.mrf.mxu1  ;;  %v2138_v47 = vsel %vm2010_vm12, %v1933_v10, %v2074_v14  ;;  %vm2011_vm0 = vcmp.gt.f32.partialorder %v1822_v25, 0.0  ;;  %v2077_v50 = vmul.f32 0.01, %v1935_v33  ;;  %v2073_v52 = vmul.f32 0.01, %v4205_v20 }
 0x467   : > { %vm2012_vm13 = vcmp.gt.f32.partialorder %v1824_v26, 0.0  ;;  %v2076_v34 = vmul.f32 0.01, %v1824_v26  ;;  %vm2014_vm14 = vcmp.gt.f32.partialorder %v1937_v27, 0.0  ;;  %v2078_v36 = vmul.f32 0.01, %v1937_v27 }
 0x468   : > { %v1829_v38 = vpop.f32.mrf.mxu0  ;;  %v1942_v40 = vpop.f32.mrf.mxu1  ;;  %vm2013_vm1 = vcmp.gt.f32.partialorder %v1935_v33, 0.0  ;;  %vm2009_vm2 = vcmp.gt.f32.partialorder %v4205_v20, 0.0  ;;  %v4219_v55 = vadd.f32 %v1827_v30, %v4180_v37  ;;  %v4223_v49 = vadd.f32 %v1940_v31, %v4182_v39 }
 0x469   : > { %v2140_v63 = vsel %vm2012_vm13, %v1824_v26, %v2076_v34  ;;  %v2142_v48 = vsel %vm2014_vm14, %v1937_v27, %v2078_v36  ;;  %v1830_v56 = vadd.f32 %v1829_v38, %v4185_v41  ;;  %v2135_v58 = vsel %vm2007_vm15, %v1818_v19, %v2071_v43 }
 0x46a   : > { %v1831_v35 = vpop.f32.mrf.mxu0  ;;  %v1944_v45 = vpop.f32.mrf.mxu1  ;;  %v2196_v15 = vpack.c.bf16 %v2140_v63, %v2136_v46  ;;  %v2198_v51 = vpack.c.bf16 %v2142_v48, %v2138_v47  ;;  %v2139_v59 = vsel %vm2011_vm0, %v1822_v25, %v2075_v44  ;;  %v2141_v6 = vsel %vm2013_vm1, %v1935_v33, %v2077_v50 }
 0x46b   : > { %v1832_v62 = vadd.f32 %v1831_v35, %v4180_v37  ;;  %v2195_v5 = vpack.c.bf16 %v2139_v59, %v2135_v58  ;;  %v1943_v7 = vadd.f32 %v1942_v40, %v4187_v42  ;;  %v2137_v9 = vsel %vm2009_vm2, %v4205_v20, %v2073_v52 }
 0x46c   : > { %v1833_v53 = vpop.f32.mrf.mxu0  ;;  %v1946_v54 = vpop.f32.mrf.mxu1  ;;  %2661 = vmatprep.mubr.bf16.mxu0 %v2196_v15  ;;  %2774 = vmatprep.mubr.bf16.mxu1 %v2198_v51  ;;  %vm2015_vm4 = vcmp.gt.f32.partialorder %v4219_v55, 0.0  ;;  %v2080_v12 = vmul.f32 0.01, %v1830_v56  ;;  %v1945_v13 = vadd.f32 %v1944_v45, %v4182_v39  ;;  %v2197_v16 = vpack.c.bf16 %v2141_v6, %v2137_v9 }
 0x46d   : > { %v1834_v57 = vadd.f32 %v1833_v53, %v4185_v41  ;;  %v1947_v2 = vadd.f32 %v1946_v54, %v4187_v42  ;;  %2662 = vmatmul.mubr.bf16.gmra.mxu0 %v2195_v5  ;;  %v2079_v4 = vmul.f32 0.01, %v4219_v55  ;;  %vm2017_vm5 = vcmp.gt.f32.partialorder %v4223_v49, 0.0 }
 0x46e   : > { %v1837_v60 = vpop.f32.mrf.mxu0  ;;  %v1950_v61 = vpop.f32.mrf.mxu1  ;;  %vm2016_vm6 = vcmp.gt.f32.partialorder %v1830_v56, 0.0  ;;  %v2083_v20 = vmul.f32 0.01, %v1832_v62  ;;  %2775 = vmatmul.mubr.bf16.gmra.mxu1 %v2197_v16  ;;  %v2081_v23 = vmul.f32 0.01, %v4223_v49  ;;  %vm2019_vm7 = vcmp.gt.f32.partialorder %v1832_v62, 0.0 }
 0x46f   : > { %vm2020_vm3 = vcmp.gt.f32.partialorder %v1834_v57, 0.0  ;;  %v2084_v8 = vmul.f32 0.01, %v1834_v57  ;;  %v4240_v17 = vadd.f32 %v1837_v60, %v4180_v37  ;;  %v2086_v21 = vmul.f32 0.01, %v1947_v2 }
 0x470   : > { %v1839_v10 = vpop.f32.mrf.mxu0  ;;  %v1952_v11 = vpop.f32.mrf.mxu1  ;;  %v4243_v22 = vadd.f32 %v1950_v61, %v4182_v39  ;;  %v2082_v24 = vmul.f32 0.01, %v1943_v7  ;;  %vm2022_vm8 = vcmp.gt.f32.partialorder %v1947_v2, 0.0  ;;  %vm2018_vm9 = vcmp.gt.f32.partialorder %v1943_v7, 0.0 }
 0x471   : > { %v2148_v3 = vsel %vm2020_vm3, %v1834_v57, %v2084_v8  ;;  %vm2021_vm10 = vcmp.gt.f32.partialorder %v1945_v13, 0.0  ;;  %v2085_v26 = vmul.f32 0.01, %v1945_v13  ;;  %v2144_v27 = vsel %vm2016_vm6, %v1830_v56, %v2080_v12 }
 0x472   : > { %v1841_v18 = vpop.f32.mrf.mxu0  ;;  %v1954_v19 = vpop.f32.mrf.mxu1  ;;  %vm2023_vm11 = vcmp.gt.f32.partialorder %v4240_v17, 0.0  ;;  %v4250_v28 = vmul.f32 0.01, %v4240_v17  ;;  %v1840_v29 = vadd.f32 %v1839_v10, %v4185_v41  ;;  %v1953_v30 = vadd.f32 %v1952_v11, %v4187_v42 }
 0x473   : > { %v2200_v31 = vpack.c.bf16 %v2148_v3, %v2144_v27  ;;  %vm2025_vm12 = vcmp.gt.f32.partialorder %v4243_v22, 0.0  ;;  %v2150_v38 = vsel %vm2022_vm8, %v1947_v2, %v2086_v21  ;;  %v2147_v40 = vsel %vm2019_vm7, %v1832_v62, %v2083_v20 }
 0x474   : > { %v1843_v14 = vpop.f32.mrf.mxu0  ;;  %v1956_v25 = vpop.f32.mrf.mxu1  ;;  %v1842_v43 = vadd.f32 %v1841_v18, %v4180_v37  ;;  %v1955_v44 = vadd.f32 %v1954_v19, %v4182_v39  ;;  %v2146_v35 = vsel %vm2018_vm9, %v1943_v7, %v2082_v24  ;;  %v2143_v45 = vsel %vm2015_vm4, %v4219_v55, %v2079_v4 }
 0x475   : > { %v1844_v34 = vadd.f32 %v1843_v14, %v4185_v41  ;;  %v1957_v36 = vadd.f32 %v1956_v25, %v4187_v42  ;;  %2671 = vmatprep.mubr.bf16.mxu0 %v2200_v31  ;;  %v2202_v47 = vpack.c.bf16 %v2150_v38, %v2146_v35  ;;  %v2199_v48 = vpack.c.bf16 %v2147_v40, %v2143_v45 }
 0x476   : > { %v1847_v32 = vpop.f32.mrf.mxu0  ;;  %v1960_v33 = vpop.f32.mrf.mxu1  ;;  %v2145_v50 = vsel %vm2017_vm5, %v4223_v49, %v2081_v23  ;;  %v2149_v15 = vsel %vm2021_vm10, %v1945_v13, %v2085_v26  ;;  %v2089_v51 = vmul.f32 0.01, %v4243_v22  ;;  %vm2024_vm13 = vcmp.gt.f32.partialorder %v1840_v29, 0.0 }
 0x477   : > { %v2201_v52 = vpack.c.bf16 %v2149_v15, %v2145_v50  ;;  %v4271_v53 = vadd.f32 %v1847_v32, %v4180_v37  ;;  %v2088_v55 = vmul.f32 0.01, %v1840_v29  ;;  %v2092_v57 = vmul.f32 0.01, %v1844_v34  ;;  %2784 = vmatprep.mubr.bf16.mxu1 %v2202_v47  ;;  %2672 = vmatmul.mubr.bf16.gmra.mxu0 %v2199_v48 }
 0x478   : > { %v1849_v46 = vpop.f32.mrf.mxu0  ;;  %v1962_v63 = vpop.f32.mrf.mxu1  ;;  %v2094_v58 = vmul.f32 0.01, %v1957_v36  ;;  %v2090_v59 = vmul.f32 0.01, %v1953_v30  ;;  %vm2028_vm14 = vcmp.gt.f32.partialorder %v1844_v34, 0.0  ;;  %vm2030_vm15 = vcmp.gt.f32.partialorder %v1957_v36, 0.0 }
 0x479   : > { %2785 = vmatmul.mubr.bf16.gmra.mxu1 %v2201_v52  ;;  %v4274_v49 = vadd.f32 %v1960_v33, %v4182_v39  ;;  %vm2026_vm0 = vcmp.gt.f32.partialorder %v1953_v30, 0.0  ;;  %vm2027_vm1 = vcmp.gt.f32.partialorder %v1842_v43, 0.0  ;;  %v2091_v62 = vmul.f32 0.01, %v1842_v43 }
 0x47a   : > { %v1851_v54 = vpop.f32.mrf.mxu0  ;;  %v1964_v56 = vpop.f32.mrf.mxu1  ;;  %vm2029_vm2 = vcmp.gt.f32.partialorder %v1955_v44, 0.0  ;;  %v2093_v2 = vmul.f32 0.01, %v1955_v44  ;;  %v4277_v5 = vmul.f32 0.01, %v4271_v53  ;;  %v4280_v6 = vadd.f32 %v1849_v46, %v4185_v41 }
 0x47b   : > { %v4283_v7 = vadd.f32 %v1962_v63, %v4187_v42  ;;  %vm2031_vm3 = vcmp.gt.f32.partialorder %v4271_v53, 0.0  ;;  %v4287_v10 = vadd.f32 %v1851_v54, %v4180_v37  ;;  %v4290_v11 = vadd.f32 %v1964_v56, %v4182_v39 }
 0x47c   : > { %v1853_v60 = vpop.f32.mrf.mxu0  ;;  %v1966_v61 = vpop.f32.mrf.mxu1  ;;  %v2156_v12 = vsel %vm2028_vm14, %v1844_v34, %v2092_v57  ;;  %v2158_v13 = vsel %vm2030_vm15, %v1957_v36, %v2094_v58  ;;  %vm2033_vm4 = vcmp.gt.f32.partialorder %v4274_v49, 0.0  ;;  %v2152_v18 = vsel %vm2024_vm13, %v1840_v29, %v2088_v55 }
 0x47d   : > { %v1854_v16 = vadd.f32 %v1853_v60, %v4185_v41  ;;  %v1967_v4 = vadd.f32 %v1966_v61, %v4187_v42  ;;  %v2154_v19 = vsel %vm2026_vm0, %v1953_v30, %v2090_v59  ;;  %v2204_v3 = vpack.c.bf16 %v2156_v12, %v2152_v18 }
 0x47e   : > { %v1857_v8 = vpop.f32.mrf.mxu0  ;;  %v1970_v9 = vpop.f32.mrf.mxu1  ;;  %v2206_v23 = vpack.c.bf16 %v2158_v13, %v2154_v19  ;;  %v2151_v24 = vsel %vm2023_vm11, %v4240_v17, %v4250_v28  ;;  %v2155_v14 = vsel %vm2027_vm1, %v1842_v43, %v2091_v62  ;;  %v2097_v25 = vmul.f32 0.01, %v4274_v49 }
 0x47f   : > { %v2203_v26 = vpack.c.bf16 %v2155_v14, %v2151_v24  ;;  %v2153_v27 = vsel %vm2025_vm12, %v4243_v22, %v2089_v51  ;;  %v2157_v29 = vsel %vm2029_vm2, %v1955_v44, %v2093_v2  ;;  %vm2032_vm5 = vcmp.gt.f32.partialorder %v4280_v6, 0.0  ;;  %2681 = vmatprep.mubr.bf16.mxu0 %v2204_v3 }
 0x480   : > { %v1859_v20 = vpop.f32.mrf.mxu0  ;;  %v1972_v21 = vpop.f32.mrf.mxu1  ;;  %2794 = vmatprep.mubr.bf16.mxu1 %v2206_v23  ;;  %v2205_v32 = vpack.c.bf16 %v2157_v29, %v2153_v27  ;;  %v4311_v17 = vadd.f32 %v1857_v8, %v4180_v37  ;;  %v4314_v28 = vadd.f32 %v1970_v9, %v4182_v39  ;;  %v2096_v33 = vmul.f32 0.01, %v4280_v6 }
 0x481   : > { %v2100_v34 = vmul.f32 0.01, %v1854_v16  ;;  %v2102_v36 = vmul.f32 0.01, %v1967_v4  ;;  %2682 = vmatmul.mubr.bf16.gmra.mxu0 %v2203_v26  ;;  %v4318_v22 = vadd.f32 %v1859_v20, %v4185_v41  ;;  %vm2034_vm6 = vcmp.gt.f32.partialorder %v4283_v7, 0.0 }
 0x482   : > { %v1861_v30 = vpop.f32.mrf.mxu0  ;;  %v1974_v31 = vpop.f32.mrf.mxu1  ;;  %v2098_v43 = vmul.f32 0.01, %v4283_v7  ;;  %vm2036_vm7 = vcmp.gt.f32.partialorder %v1854_v16, 0.0  ;;  %vm2038_vm8 = vcmp.gt.f32.partialorder %v1967_v4, 0.0  ;;  %2795 = vmatmul.mubr.bf16.gmra.mxu1 %v2205_v32  ;;  %vm2035_vm9 = vcmp.gt.f32.partialorder %v4287_v10, 0.0 }
 0x483   : > { %v2099_v44 = vmul.f32 0.01, %v4287_v10  ;;  %vm2037_vm10 = vcmp.gt.f32.partialorder %v4290_v11, 0.0  ;;  %v2101_v35 = vmul.f32 0.01, %v4290_v11  ;;  %v4333_v48 = vadd.f32 %v1972_v21, %v4187_v42 }
 0x484   : > { %v1863_v38 = vpop.f32.mrf.mxu0  ;;  %v1976_v40 = vpop.f32.mrf.mxu1  ;;  %v4327_v63 = vmul.f32 0.01, %v4311_v17  ;;  %v4330_v47 = vmul.f32 0.01, %v4314_v28  ;;  %v4336_v50 = vadd.f32 %v1861_v30, %v4180_v37  ;;  %vm2039_vm11 = vcmp.gt.f32.partialorder %v4311_v17, 0.0 }
 0x485   : > { %vm2040_vm12 = vcmp.gt.f32.partialorder %v4318_v22, 0.0  ;;  %v2104_v15 = vmul.f32 0.01, %v4318_v22  ;;  %v2164_v51 = vsel %vm2036_vm7, %v1854_v16, %v2100_v34  ;;  %v2166_v52 = vsel %vm2038_vm8, %v1967_v4, %v2102_v36 }
 0x486   : > { %v1867_v45 = vpop.f32.mrf.mxu0  ;;  %v1980_v46 = vpop.f32.mrf.mxu1  ;;  %vm2041_vm13 = vcmp.gt.f32.partialorder %v4314_v28, 0.0  ;;  %v4345_v55 = vadd.f32 %v1974_v31, %v4182_v39  ;;  %v1864_v57 = vadd.f32 %v1863_v38, %v4185_v41  ;;  %v2160_v58 = vsel %vm2032_vm5, %v4280_v6, %v2096_v33 }
 0x487   : > { %v2162_v59 = vsel %vm2034_vm6, %v4283_v7, %v2098_v43  ;;  %v1977_v60 = vadd.f32 %v1976_v40, %v4187_v42  ;;  %v2208_v61 = vpack.c.bf16 %v2164_v51, %v2160_v58  ;;  %v2159_v2 = vsel %vm2031_vm3, %v4271_v53, %v4277_v5 }
 0x488   : > { %v1869_v54 = vpop.f32.mrf.mxu0  ;;  %v1982_v56 = vpop.f32.mrf.mxu1  ;;  %v2210_v62 = vpack.c.bf16 %v2166_v52, %v2162_v59  ;;  %v2163_v12 = vsel %vm2035_vm9, %v4287_v10, %v2099_v44  ;;  %v2161_v6 = vsel %vm2033_vm4, %v4274_v49, %v2097_v25  ;;  %v2165_v7 = vsel %vm2037_vm10, %v4290_v11, %v2101_v35 }
 0x489   : > { %v4369_v13 = vadd.f32 %v1867_v45, %v4180_v37  ;;  %vm2042_vm14 = vcmp.gt.f32.partialorder %v4333_v48, 0.0  ;;  %2691 = vmatprep.mubr.bf16.mxu0 %v2208_v61  ;;  %v2207_v53 = vpack.c.bf16 %v2163_v12, %v2159_v2  ;;  %v2209_v5 = vpack.c.bf16 %v2165_v7, %v2161_v6 }
 0x48a   : > { %v1871_v8 = vpop.f32.mrf.mxu0  ;;  %v1984_v9 = vpop.f32.mrf.mxu1  ;;  %2804 = vmatprep.mubr.bf16.mxu1 %v2210_v62  ;;  %v4373_v16 = vadd.f32 %v1980_v46, %v4182_v39  ;;  %v2106_v49 = vmul.f32 0.01, %v4333_v48  ;;  %v2108_v18 = vmul.f32 0.01, %v1864_v57  ;;  %v4377_v19 = vadd.f32 %v1869_v54, %v4185_v41 }
 0x48b   : > { %v4380_v11 = vadd.f32 %v1982_v56, %v4187_v42  ;;  %vm2043_vm15 = vcmp.gt.f32.partialorder %v4336_v50, 0.0  ;;  %v2107_v20 = vmul.f32 0.01, %v4336_v50  ;;  %vm2044_vm0 = vcmp.gt.f32.partialorder %v1864_v57, 0.0  ;;  %2692 = vmatmul.mubr.bf16.gmra.mxu0 %v2207_v53  ;;  %2805 = vmatmul.mubr.bf16.gmra.mxu1 %v2209_v5 }
 0x48c   : > { %v1873_v10 = vpop.f32.mrf.mxu0  ;;  %v1986_v4 = vpop.f32.mrf.mxu1  ;;  %v2110_v21 = vmul.f32 0.01, %v1977_v60  ;;  %vm2045_vm1 = vcmp.gt.f32.partialorder %v4345_v55, 0.0  ;;  %v2109_v24 = vmul.f32 0.01, %v4345_v55  ;;  %vm2046_vm2 = vcmp.gt.f32.partialorder %v1977_v60, 0.0 }
 0x48d   : > { %v4387_v14 = vadd.f32 %v1871_v8, %v4180_v37  ;;  %vm2047_vm3 = vcmp.gt.f32.partialorder %v4369_v13, 0.0  ;;  %v2111_v25 = vmul.f32 0.01, %v4369_v13  ;;  %v4392_v26 = vmul.f32 0.01, %v4373_v16 }
 0x48e   : > { %v1877_v3 = vpop.f32.mrf.mxu0  ;;  %v1990_v23 = vpop.f32.mrf.mxu1  ;;  %vm2048_vm4 = vcmp.gt.f32.partialorder %v4377_v19, 0.0  ;;  %v4396_v27 = vadd.f32 %v1984_v9, %v4182_v39  ;;  %v2112_v31 = vmul.f32 0.01, %v4377_v19  ;;  %vm2050_vm5 = vcmp.gt.f32.partialorder %v4380_v11, 0.0 }
 0x48f   : > { %v2168_v32 = vsel %vm2040_vm12, %v4318_v22, %v2104_v15  ;;  %v2172_v33 = vsel %vm2044_vm0, %v1864_v57, %v2108_v18  ;;  %vm2049_vm6 = vcmp.gt.f32.partialorder %v4373_v16, 0.0  ;;  %v2114_v34 = vmul.f32 0.01, %v4380_v11 }
 0x490   : > { %v1879_v29 = vpop.f32.mrf.mxu0  ;;  %v1992_v30 = vpop.f32.mrf.mxu1  ;;  %v1874_v36 = vadd.f32 %v1873_v10, %v4185_v41  ;;  %v2212_v38 = vpack.c.bf16 %v2172_v33, %v2168_v32  ;;  %v2174_v40 = vsel %vm2046_vm2, %v1977_v60, %v2110_v21  ;;  %vm2051_vm7 = vcmp.gt.f32.partialorder %v4387_v14, 0.0  ;;  %v2287_v33 = vld [vmem:[%s4597_s7 + $0x9] sm:$0x3] }
 0x491   : > { %v1987_v43 = vadd.f32 %v1986_v4, %v4187_v42  ;;  %v2170_v44 = vsel %vm2042_vm14, %v4333_v48, %v2106_v49  ;;  %v2167_v22 = vsel %vm2039_vm11, %v4311_v17, %v4327_v63  ;;  %v2171_v15 = vsel %vm2043_vm15, %v4336_v50, %v2107_v20 }
 0x492   : > { %v1881_v35 = vpop.f32.mrf.mxu0  ;;  %v1994_v45 = vpop.f32.mrf.mxu1  ;;  %2701 = vmatprep.mubr.bf16.mxu0 %v2212_v38  ;;  %v2214_v46 = vpack.c.bf16 %v2174_v40, %v2170_v44  ;;  %v2169_v51 = vsel %vm2041_vm13, %v4314_v28, %v4330_v47  ;;  %v2173_v48 = vsel %vm2045_vm1, %v4345_v55, %v2109_v24  ;;  %v2115_v52 = vmul.f32 0.01, %v4387_v14 }
 0x493   : > { %vm2053_vm8 = vcmp.gt.f32.partialorder %v4396_v27, 0.0  ;;  %v2211_v17 = vpack.c.bf16 %v2171_v15, %v2167_v22  ;;  %v2213_v63 = vpack.c.bf16 %v2173_v48, %v2169_v51  ;;  %v2116_v54 = vmul.f32 0.01, %v1874_v36 }
 0x494   : > { %2814 = vmatprep.mubr.bf16.mxu1 %v2214_v46  ;;  %v1880_v56 = vadd.f32 %v1879_v29, %v4185_v41  ;;  %v1993_v50 = vadd.f32 %v1992_v30, %v4187_v42  ;;  %v1882_v57 = vadd.f32 %v1881_v35, %v4180_v37  ;;  %v2117_v28 = vmul.f32 0.01, %v4396_v27  ;;  %v1883_v55 = vpop.f32.mrf.mxu0  ;;  %v1996_v58 = vpop.f32.mrf.mxu1 }
 0x495   : > { %vm2052_vm9 = vcmp.gt.f32.partialorder %v1874_v36, 0.0  ;;  %vm2054_vm10 = vcmp.gt.f32.partialorder %v1987_v43, 0.0  ;;  %v2118_v47 = vmul.f32 0.01, %v1987_v43  ;;  %2702 = vmatmul.mubr.bf16.gmra.mxu0 %v2211_v17  ;;  %2815 = vmatmul.mubr.bf16.gmra.mxu1 %v2213_v63  ;;  %v1878_v59 = vadd.f32 %v1877_v3, %v4180_v37 }
 0x496   : > { %v1991_v60 = vadd.f32 %v1990_v23, %v4182_v39  ;;  %v2120_v61 = vmul.f32 0.01, %v1880_v56  ;;  %v1995_v62 = vadd.f32 %v1994_v45, %v4182_v39  ;;  %vm2056_vm11 = vcmp.gt.f32.partialorder %v1880_v56, 0.0 }
 0x497   : > { %vm2058_vm12 = vcmp.gt.f32.partialorder %v1993_v50, 0.0  ;;  %v2122_v2 = vmul.f32 0.01, %v1993_v50  ;;  %v2123_v8 = vmul.f32 0.01, %v1882_v57  ;;  %v1884_v9 = vadd.f32 %v1883_v55, %v4185_v41 }
 0x498   : > { %v1997_v12 = vadd.f32 %v1996_v58, %v4187_v42  ;;  %v2176_v6 = vsel %vm2048_vm4, %v4377_v19, %v2112_v31  ;;  %v2180_v7 = vsel %vm2052_vm9, %v1874_v36, %v2116_v54  ;;  %v2178_v53 = vsel %vm2050_vm5, %v4380_v11, %v2114_v34 }
 0x499   : > { %v2216_v37 = vpack.c.bf16 %v2180_v7, %v2176_v6  ;;  %v2182_v39 = vsel %vm2054_vm10, %v1987_v43, %v2118_v47  ;;  %v2175_v5 = vsel %vm2047_vm3, %v4369_v13, %v2111_v25  ;;  %vm2060_vm13 = vcmp.gt.f32.partialorder %v1884_v9, 0.0 }
 0x49a   : > { %v2124_v41 = vmul.f32 0.01, %v1884_v9  ;;  %vm2062_vm14 = vcmp.gt.f32.partialorder %v1997_v12, 0.0  ;;  %v2126_v42 = vmul.f32 0.01, %v1997_v12  ;;  %v2218_v10 = vpack.c.bf16 %v2182_v39, %v2178_v53 }
 0x49b   : > { %2711 = vmatprep.mubr.bf16.mxu0 %v2216_v37  ;;  %v2179_v4 = vsel %vm2051_vm7, %v4387_v14, %v2115_v52  ;;  %v2177_v49 = vsel %vm2049_vm6, %v4373_v16, %v4392_v26  ;;  %v2181_v18 = vsel %vm2053_vm8, %v4396_v27, %v2117_v28  ;;  %v2184_v11 = vsel %vm2056_vm11, %v1880_v56, %v2120_v61 }
 0x49c   : > { %v2215_v13 = vpack.c.bf16 %v2179_v4, %v2175_v5  ;;  %v2217_v19 = vpack.c.bf16 %v2181_v18, %v2177_v49  ;;  %v2188_v20 = vsel %vm2060_vm13, %v1884_v9, %v2124_v41  ;;  %v2125_v21 = vmul.f32 0.01, %v1995_v62  ;;  %2824 = vmatprep.mubr.bf16.mxu1 %v2218_v10 }
 0x49d   : > { %v2220_v3 = vpack.c.bf16 %v2188_v20, %v2184_v11  ;;  %v2186_v23 = vsel %vm2058_vm12, %v1993_v50, %v2122_v2  ;;  %v2190_v24 = vsel %vm2062_vm14, %v1997_v12, %v2126_v42  ;;  %vm2059_vm15 = vcmp.gt.f32.partialorder %v1882_v57, 0.0 }
 0x49e   : > { %vm2061_vm0 = vcmp.gt.f32.partialorder %v1995_v62, 0.0  ;;  %2712 = vmatmul.mubr.bf16.gmra.mxu0 %v2215_v13  ;;  %2825 = vmatmul.mubr.bf16.gmra.mxu1 %v2217_v19  ;;  %v2222_v16 = vpack.c.bf16 %v2190_v24, %v2186_v23  ;;  %v2119_v14 = vmul.f32 0.01, %v1878_v59  ;;  %v2121_v25 = vmul.f32 0.01, %v1991_v60 }
 0x49f   : > { %2721 = vmatprep.mubr.bf16.mxu0 %v2220_v3  ;;  %vm2055_vm1 = vcmp.gt.f32.partialorder %v1878_v59, 0.0  ;;  %vm2057_vm2 = vcmp.gt.f32.partialorder %v1991_v60, 0.0  ;;  %v2187_v26 = vsel %vm2059_vm15, %v1882_v57, %v2123_v8  ;;  %v2189_v27 = vsel %vm2061_vm0, %v1995_v62, %v2125_v21 }
 0x4a0   : > { %2834 = vmatprep.mubr.bf16.mxu1 %v2222_v16  ;;  %v2183_v29 = vsel %vm2055_vm1, %v1878_v59, %v2119_v14  ;;  %v2185_v30 = vsel %vm2057_vm2, %v1991_v60, %v2121_v25  ;;  %v4466_v34 = vrot.slane %v2287_v33, %v4125_v1  ;;  %v4471_v36 = vrot.slane %v2287_v33, %v4122_v0 }
 0x4a1   : > { %v2219_v31 = vpack.c.bf16 %v2187_v26, %v2183_v29  ;;  %v2221_v32 = vpack.c.bf16 %v2189_v27, %v2185_v30 }
 0x4a6   : > { %2722 = vmatmul.mubr.bf16.gmra.mxu0 %v2219_v31  ;;  %2835 = vmatmul.mubr.bf16.gmra.mxu1 %v2221_v32 }
 0x525   : > { %v2653_v38 = vpop.f32.mrf.mxu0  ;;  %v2766_v40 = vpop.f32.mrf.mxu1 }
 0x526   : > { %v2654_v43 = vadd.f32 %v2653_v38, %v4466_v34 }
 0x527   : > { %v2655_v44 = vpop.f32.mrf.mxu0  ;;  %v2768_v22 = vpop.f32.mrf.mxu1 }
 0x528   : > { %v2767_v35 = vadd.f32 %v2766_v40, %v2654_v43  ;;  %v2656_v45 = vadd.f32 %v2655_v44, %v4471_v36 }
 0x529   : > { %v2657_v46 = vpop.f32.mrf.mxu0  ;;  %v2770_v15 = vpop.f32.mrf.mxu1 }
 0x52a   : > { %2845 = vst [vmem:[%s4475_s12] sm:$0xff] %v2767_v35  ;;  %v2769_v0 = vadd.f32 %v2768_v22, %v2656_v45  ;;  %v2658_v1 = vadd.f32 %v2657_v46, %v4466_v34 }
 0x52b   : > { %v2659_v51 = vpop.f32.mrf.mxu0  ;;  %v2772_v48 = vpop.f32.mrf.mxu1 }
 0x52c   : > { %2846 = vst [vmem:[%s4475_s12 + $0x8] sm:$0xff] %v2769_v0  ;;  %v2771_v52 = vadd.f32 %v2770_v15, %v2658_v1  ;;  %v2660_v17 = vadd.f32 %v2659_v51, %v4471_v36 }
 0x52d   : > { %v2663_v63 = vpop.f32.mrf.mxu0 }
 0x52e   : > { %2847 = vst [vmem:[%s4475_s12 + $0x10] sm:$0xff] %v2771_v52  ;;  %v2773_v54 = vadd.f32 %v2772_v48, %v2660_v17  ;;  %v2664_v56 = vadd.f32 %v2663_v63, %v4466_v34  ;;  %v2776_v50 = vpop.f32.mrf.mxu1 }
 0x52f   : > { %v2665_v57 = vpop.f32.mrf.mxu0 }
 0x530   : > { %2848 = vst [vmem:[%s4475_s12 + $0x18] sm:$0xff] %v2773_v54  ;;  %v2777_v28 = vadd.f32 %v2776_v50, %v2664_v56  ;;  %v2666_v47 = vadd.f32 %v2665_v57, %v4471_v36  ;;  %v2778_v55 = vpop.f32.mrf.mxu1 }
 0x531   : > { %v2667_v58 = vpop.f32.mrf.mxu0 }
 0x532   : > { %2849 = vst [vmem:[%s4475_s12 + $0x20] sm:$0xff] %v2777_v28  ;;  %v2779_v59 = vadd.f32 %v2778_v55, %v2666_v47  ;;  %v2668_v60 = vadd.f32 %v2667_v58, %v4466_v34  ;;  %v2780_v61 = vpop.f32.mrf.mxu1 }
 0x533   : > { %v2669_v62 = vpop.f32.mrf.mxu0 }
 0x534   : > { %2850 = vst [vmem:[%s4475_s12 + $0x28] sm:$0xff] %v2779_v59  ;;  %v2781_v2 = vadd.f32 %v2780_v61, %v2668_v60  ;;  %v2670_v8 = vadd.f32 %v2669_v62, %v4471_v36  ;;  %v2782_v9 = vpop.f32.mrf.mxu1 }
 0x536   : > { %2851 = vst [vmem:[%s4475_s12 + $0x30] sm:$0xff] %v2781_v2  ;;  %v2783_v12 = vadd.f32 %v2782_v9, %v2670_v8 }
 0x537   : > { %v2673_v6 = vpop.f32.mrf.mxu0 }
 0x538   : > { %2852 = vst [vmem:[%s4475_s12 + $0x38] sm:$0xff] %v2783_v12  ;;  %v2674_v7 = vadd.f32 %v2673_v6, %v4466_v34 }
 0x539   : > { %v2786_v37 = vpop.f32.mrf.mxu1  ;;  %v2675_v53 = vpop.f32.mrf.mxu0 }
 0x53a   : > { %v2787_v39 = vadd.f32 %v2786_v37, %v2674_v7  ;;  %v2676_v5 = vadd.f32 %v2675_v53, %v4471_v36 }
 0x53b   : > { %v2788_v41 = vpop.f32.mrf.mxu1  ;;  %v2677_v42 = vpop.f32.mrf.mxu0 }
 0x53c   : > { %2853 = vst [vmem:[%s4475_s12 + $0x40] sm:$0xff] %v2787_v39  ;;  %v2789_v10 = vadd.f32 %v2788_v41, %v2676_v5  ;;  %v2678_v4 = vadd.f32 %v2677_v42, %v4466_v34 }
 0x53d   : > { %v2790_v49 = vpop.f32.mrf.mxu1  ;;  %v2679_v18 = vpop.f32.mrf.mxu0 }
 0x53e   : > { %2854 = vst [vmem:[%s4475_s12 + $0x48] sm:$0xff] %v2789_v10  ;;  %v2791_v13 = vadd.f32 %v2790_v49, %v2678_v4  ;;  %v2680_v19 = vadd.f32 %v2679_v18, %v4471_v36 }
 0x53f   : > { %v2792_v11 = vpop.f32.mrf.mxu1 }
 0x540   : > { %2855 = vst [vmem:[%s4475_s12 + $0x50] sm:$0xff] %v2791_v13  ;;  %v2793_v20 = vadd.f32 %v2792_v11, %v2680_v19 }
 0x541   : > { %v2683_v21 = vpop.f32.mrf.mxu0 }
 0x542   : > { %v2684_v3 = vadd.f32 %v2683_v21, %v4466_v34  ;;  %v2796_v23 = vpop.f32.mrf.mxu1  ;;  %2856 = vst [vmem:[%s4475_s12 + $0x58] sm:$0xff] %v2793_v20 }
 0x543   : > { %v2685_v24 = vpop.f32.mrf.mxu0 }
 0x544   : > { %v2797_v16 = vadd.f32 %v2796_v23, %v2684_v3  ;;  %v2686_v14 = vadd.f32 %v2685_v24, %v4471_v36  ;;  %v2798_v25 = vpop.f32.mrf.mxu1 }
 0x545   : > { %v2687_v26 = vpop.f32.mrf.mxu0 }
 0x546   : > { %2857 = vst [vmem:[%s4475_s12 + $0x60] sm:$0xff] %v2797_v16  ;;  %v2799_v27 = vadd.f32 %v2798_v25, %v2686_v14  ;;  %v2688_v29 = vadd.f32 %v2687_v26, %v4466_v34  ;;  %v2800_v30 = vpop.f32.mrf.mxu1 }
 0x547   : > { %v2689_v31 = vpop.f32.mrf.mxu0 }
 0x548   : > { %2858 = vst [vmem:[%s4475_s12 + $0x68] sm:$0xff] %v2799_v27  ;;  %v2801_v32 = vadd.f32 %v2800_v30, %v2688_v29  ;;  %v2690_v33 = vadd.f32 %v2689_v31, %v4471_v36  ;;  %v2802_v38 = vpop.f32.mrf.mxu1 }
 0x54a   : > { %2859 = vst [vmem:[%s4475_s12 + $0x70] sm:$0xff] %v2801_v32  ;;  %v2803_v40 = vadd.f32 %v2802_v38, %v2690_v33 }
 0x54b   : > { %v2693_v43 = vpop.f32.mrf.mxu0  ;;  %v2806_v44 = vpop.f32.mrf.mxu1 }
 0x54c   : > { %2860 = vst [vmem:[%s4475_s12 + $0x78] sm:$0xff] %v2803_v40  ;;  %v2694_v22 = vadd.f32 %v2693_v43, %v4466_v34 }
 0x54d   : > { %v2695_v35 = vpop.f32.mrf.mxu0  ;;  %v2808_v45 = vpop.f32.mrf.mxu1 }
 0x54e   : > { %v2807_v46 = vadd.f32 %v2806_v44, %v2694_v22  ;;  %v2696_v15 = vadd.f32 %v2695_v35, %v4471_v36 }
 0x54f   : > { %v2697_v0 = vpop.f32.mrf.mxu0  ;;  %v2810_v1 = vpop.f32.mrf.mxu1 }
 0x550   : > { %2861 = vst [vmem:[%s4475_s12 + $0x80] sm:$0xff] %v2807_v46  ;;  %v2809_v51 = vadd.f32 %v2808_v45, %v2696_v15  ;;  %v2698_v48 = vadd.f32 %v2697_v0, %v4466_v34 }
 0x551   : > { %v2699_v52 = vpop.f32.mrf.mxu0  ;;  %v2812_v17 = vpop.f32.mrf.mxu1 }
 0x552   : > { %2862 = vst [vmem:[%s4475_s12 + $0x88] sm:$0xff] %v2809_v51  ;;  %v2811_v63 = vadd.f32 %v2810_v1, %v2698_v48  ;;  %v2700_v54 = vadd.f32 %v2699_v52, %v4471_v36 }
 0x554   : > { %2863 = vst [vmem:[%s4475_s12 + $0x90] sm:$0xff] %v2811_v63  ;;  %v2813_v56 = vadd.f32 %v2812_v17, %v2700_v54 }
 0x555   : > { %v2703_v50 = vpop.f32.mrf.mxu0  ;;  %v2816_v57 = vpop.f32.mrf.mxu1 }
 0x556   : > { %v2704_v28 = vadd.f32 %v2703_v50, %v4466_v34  ;;  %2864 = vst [vmem:[%s4475_s12 + $0x98] sm:$0xff] %v2813_v56 }
 0x557   : > { %v2705_v47 = vpop.f32.mrf.mxu0  ;;  %v2818_v55 = vpop.f32.mrf.mxu1 }
 0x558   : > { %v2817_v58 = vadd.f32 %v2816_v57, %v2704_v28  ;;  %v2706_v59 = vadd.f32 %v2705_v47, %v4471_v36 }
 0x559   : > { %v2707_v60 = vpop.f32.mrf.mxu0  ;;  %v2820_v61 = vpop.f32.mrf.mxu1 }
 0x55a   : > { %2865 = vst [vmem:[%s4475_s12 + $0xa0] sm:$0xff] %v2817_v58  ;;  %v2819_v62 = vadd.f32 %v2818_v55, %v2706_v59  ;;  %v2708_v2 = vadd.f32 %v2707_v60, %v4466_v34 }
 0x55b   : > { %v2709_v8 = vpop.f32.mrf.mxu0  ;;  %v2822_v9 = vpop.f32.mrf.mxu1 }
 0x55c   : > { %2866 = vst [vmem:[%s4475_s12 + $0xa8] sm:$0xff] %v2819_v62  ;;  %v2821_v12 = vadd.f32 %v2820_v61, %v2708_v2  ;;  %v2710_v6 = vadd.f32 %v2709_v8, %v4471_v36 }
 0x55e   : > { %2867 = vst [vmem:[%s4475_s12 + $0xb0] sm:$0xff] %v2821_v12  ;;  %v2823_v7 = vadd.f32 %v2822_v9, %v2710_v6  ;;  %v2713_v37 = vpop.f32.mrf.mxu0  ;;  %v2826_v53 = vpop.f32.mrf.mxu1 }
 0x55f   : > { %v2714_v39 = vadd.f32 %v2713_v37, %v4466_v34 }
 0x560   : > { %2868 = vst [vmem:[%s4475_s12 + $0xb8] sm:$0xff] %v2823_v7  ;;  %v2715_v5 = vpop.f32.mrf.mxu0  ;;  %v2828_v41 = vpop.f32.mrf.mxu1 }
 0x561   : > { %v2827_v42 = vadd.f32 %v2826_v53, %v2714_v39  ;;  %v2716_v10 = vadd.f32 %v2715_v5, %v4471_v36 }
 0x562   : > { %v2717_v4 = vpop.f32.mrf.mxu0  ;;  %v2830_v49 = vpop.f32.mrf.mxu1 }
 0x563   : > { %2869 = vst [vmem:[%s4475_s12 + $0xc0] sm:$0xff] %v2827_v42  ;;  %v2829_v18 = vadd.f32 %v2828_v41, %v2716_v10  ;;  %v2718_v13 = vadd.f32 %v2717_v4, %v4466_v34 }
 0x564   : > { %v2719_v19 = vpop.f32.mrf.mxu0  ;;  %v2832_v11 = vpop.f32.mrf.mxu1 }
 0x565   : > { %2870 = vst [vmem:[%s4475_s12 + $0xc8] sm:$0xff] %v2829_v18  ;;  %v2831_v20 = vadd.f32 %v2830_v49, %v2718_v13  ;;  %v2720_v21 = vadd.f32 %v2719_v19, %v4471_v36 }
 0x566   : > { %v2723_v3 = vpop.f32.mrf.mxu0  ;;  %v2836_v23 = vpop.f32.mrf.mxu1 }
 0x567   : > { %2871 = vst [vmem:[%s4475_s12 + $0xd0] sm:$0xff] %v2831_v20  ;;  %v2833_v24 = vadd.f32 %v2832_v11, %v2720_v21  ;;  %v2724_v16 = vadd.f32 %v2723_v3, %v4466_v34 }
 0x568   : > { %v2725_v14 = vpop.f32.mrf.mxu0  ;;  %v2838_v25 = vpop.f32.mrf.mxu1 }
 0x569   : > { %2872 = vst [vmem:[%s4475_s12 + $0xd8] sm:$0xff] %v2833_v24  ;;  %v2837_v26 = vadd.f32 %v2836_v23, %v2724_v16  ;;  %v2726_v27 = vadd.f32 %v2725_v14, %v4471_v36 }
 0x56a   : > { %v2727_v29 = vpop.f32.mrf.mxu0  ;;  %v2840_v30 = vpop.f32.mrf.mxu1 }
 0x56b   : > { %2873 = vst [vmem:[%s4475_s12 + $0xe0] sm:$0xff] %v2837_v26  ;;  %v2839_v31 = vadd.f32 %v2838_v25, %v2726_v27  ;;  %v2728_v32 = vadd.f32 %v2727_v29, %v4466_v34 }
 0x56c   : > { %v2729_v33 = vpop.f32.mrf.mxu0  ;;  %v2842_v43 = vpop.f32.mrf.mxu1 }
 0x56d   : > { %2874 = vst [vmem:[%s4475_s12 + $0xe8] sm:$0xff] %v2839_v31  ;;  %v2841_v38 = vadd.f32 %v2840_v30, %v2728_v32  ;;  %v2730_v40 = vadd.f32 %v2729_v33, %v4471_v36 }
 0x56f   : > { %2875 = vst [vmem:[%s4475_s12 + $0xf0] sm:$0xff] %v2841_v38  ;;  %v2843_v34 = vadd.f32 %v2842_v43, %v2730_v40 }
 0x571   : > { %2876 = vst [vmem:[%s4475_s12 + $0xf8] sm:$0xff] %v2843_v34 }
 0x572   : > { %3734 = shalt.err (!%p3731_p8)
}
 0x573   : > { %s3735_s17 = scalar_lea.hbm %s4542_s10, 4096  ;;  %s3739_s12 = scalar_lea.hbm %s4598_s8, 8192 }
 0x574   : > { %p3736_p13 = scmp.ne.s32.totalorder %s4542_s10, %s3735_s17  ;;  %p3740_p6 = scmp.lt.s32.totalorder %s4542_s10, %s4598_s8 }
 0x575   : > { %p3741_p12 = scmp.lt.s32.totalorder %s3739_s12, %s3735_s17 }
 0x576   : > { %p3737_p11 = pnand %p3736_p13, %p4611_p1 }
 0x577   : > { %p3742_p10 = por %p3741_p12, %p3740_p6 }
 0x578   : > { %p3738_p0 = pneg %p3737_p11 }
 0x57a   : > { %p3743_p9 = pnand %p3742_p10, %p3738_p0 }
 0x57c   : > { %3746 = shalt.err (!%p3743_p9)
}
 0x57d   : > { %s3807_s26 = smov 256   ;;  %s3808_s21 = smov 16  }
 0x57e   : > { %3313 = dma.vmem_to_hbm [thread:$0]  (%p4611_p1), %s4544_s18, 4096, %s4542_s10, %s4550_s9, %s3807_s26, %s3807_s26, %s3808_s21  }
 0x57f PF: > { %p3340_p3 = scmp.ge.s32.totalorder %s3793_s30, 2  ;;  %s2907_s23 = sand.u32 1, %s3781_s27  }
 0x580   : > { %p4612_p5 = scmp.ne.s32.totalorder %s4602_s16, 0  ;;  %s2908_s19 = scalar_lea.sflag [#allocation4], %s2907_s23 }
 0x582   : > { %p3329_p2 = pnand %p3340_p3, %p4612_p5 }
 0x584   : > { %p3330_p4 = pneg %p3329_p2 }
 0x586   : > { %3776 = dma.done.wait (%p3330_p4), %s2908_s19, 4096  }
 0x587   : > { %3778 = vsyncadd (%p3330_p4), %s2908_s19, 4294963200  ;;  %p21_p7 = scmp.ge.s32.totalorder %s3879_s11, 4   ;;  %s4613_s27 = smov %s3785_s28 }
 0x588   : > { %s4614_s28 = smov %s3789_s29  ;;  %s4615_s29 = smov %s3890_s14 }
 0x589   : > { %s4616_s30 = smov %s3879_s11  ;;  %23 = sbr.rel (!%p21_p7) target bundleno = 6 (0x6), region = 104 }
 0x58e   :  { %2913 = vsyncpa [#allocation3], 1 }
 0x58f   :  { %2915 = vsyncpa [#allocation3 + $0x1], 1 }
 0x590   :  { %2916 = vsyncpa [#allocation6], 1 }
 0x591   :  { %2917 = vsyncpa [#allocation9], 1 }
 0x592   :  { %2918 = vsyncpa [#allocation4], 1 }
 0x593   :  { %2920 = vsyncpa [#allocation4 + $0x1], 1 }

</bundles_post_ra>
